<compile_context>
chip_gen: v7x
topology: tpu7x:2x2x1
jax: 0.10.0
libtpu: 0.0.40
codegen_flags: <defaults>
</compile_context>

<pallas_src>
import functools
import math

import jax
import jax.numpy as jnp
from jax.experimental import pallas as pl
from jax.experimental.pallas import tpu as pltpu

EPS = 1e-5  # PyTorch BatchNorm1d default eps


def _batchnorm2d(a, gamma, beta):
    # Training-mode BatchNorm1d over rows of [BN, D]; biased variance.
    # Single-pass statistics: var = E[x^2] - mean^2 (one cross-sublane reduce pass each).
    mean = jnp.mean(a, axis=0, keepdims=True)
    msq = jnp.mean(a * a, axis=0, keepdims=True)
    var = msq - mean * mean
    return (a - mean) * jax.lax.rsqrt(var + EPS) * gamma + beta


# ----------------------------- fused Pallas kernel -------------------------- #

def fused_encoder_kernel(L, B, N, H, dk,
                         data_ref, we_ref, be_ref,
                         wqkv_ref, wc_ref, bc_ref,
                         g1_ref, b1_ref, w1_ref, bf1_ref, w2_ref, bf2_ref,
                         g2_ref, b2_ref, o_ref):
    BN = B * N
    HD = H * dk
    scale = 1.0 / math.sqrt(dk)

    # Input embedding: contraction dim is only 2 -> cheaper as VPU broadcast mul/add.
    d = data_ref[...]                               # [BN, 2]
    we = we_ref[...]                                # [2, D]
    x = d[:, 0:1] * we[0:1, :] + d[:, 1:2] * we[1:2, :] + be_ref[...]   # [BN, D]

    def split_heads(t):                             # [BN, HD] -> [H*B, N, dk] (head-major)
        return jnp.concatenate(
            [t[:, h * dk:(h + 1) * dk].reshape(B, N, dk) for h in range(H)], axis=0)

    # All L encoder layers, statically unrolled; activation `x` never leaves VMEM/vregs.
    for l in range(L):
        # Fused QKV projection: one [BN, D] @ [D, 3*HD] matmul.
        qkv = jnp.dot(x, wqkv_ref[l], preferred_element_type=jnp.float32)   # [BN, 3*HD]

        q = split_heads(qkv[:, 0 * HD:1 * HD])       # [H*B, N, dk]
        k = split_heads(qkv[:, 1 * HD:2 * HD])
        v = split_heads(qkv[:, 2 * HD:3 * HD])

        # Batched attention over all heads at once (single dot_general per side).
        s = jnp.einsum('gnd,gmd->gnm', q, k,
                       preferred_element_type=jnp.float32) * scale          # [H*B, N, N]
        s = s - jnp.max(s, axis=-1, keepdims=True)
        e = jnp.exp(s)
        p = e / jnp.sum(e, axis=-1, keepdims=True)                          # exact softmax
        o = jnp.einsum('gnm,gmd->gnd', p, v,
                       preferred_element_type=jnp.float32)                  # [H*B, N, dk]

        # Lane-concat heads back to [BN, HD]; one combine matmul with Wc.
        o3 = o.reshape(H, BN, dk)
        o_concat = jnp.concatenate([o3[h] for h in range(H)], axis=-1)      # [BN, HD]
        mh = jnp.dot(o_concat, wc_ref[l],
                     preferred_element_type=jnp.float32) + bc_ref[l]

        out1 = _batchnorm2d(x + mh, g1_ref[l], b1_ref[l])

        hidden = jnp.dot(out1, w1_ref[l], preferred_element_type=jnp.float32) + bf1_ref[l]
        hidden = jnp.maximum(hidden, 0.0)
        ff = jnp.dot(hidden, w2_ref[l], preferred_element_type=jnp.float32) + bf2_ref[l]

        x = _batchnorm2d(out1 + ff, g2_ref[l], b2_ref[l])

    o_ref[...] = x


# ----------------------------- wrapper -------------------------------------- #

def pack_params(params):
    """Stack per-layer weights along a leading L axis; fuse Wq/Wk/Wv column-wise."""
    layers = params['layers']
    stk = lambda key: jnp.stack([p[key] for p in layers], axis=0)
    return dict(
        We=params['We'], be=params['be'],
        Wqkv=jnp.stack([jnp.concatenate([p['Wq'], p['Wk'], p['Wv']], axis=1)
                        for p in layers], axis=0),                 # [L, D, 3*H*dk]
        Wc=stk('Wc'), bc=stk('bc'),
        g1=stk('g1'), b1=stk('b1'),
        W1=stk('W1'), bf1=stk('bf1'),
        W2=stk('W2'), bf2=stk('bf2'),
        g2=stk('g2'), b2=stk('b2'),
    )


def kp_encoder_forward(data, packed, head_num, qkv_dim):
    B, N, two = data.shape
    BN = B * N
    D = packed['We'].shape[1]
    L = packed['Wqkv'].shape[0]

    data2 = data.reshape(BN, two)
    kern = functools.partial(fused_encoder_kernel, L, B, N, head_num, qkv_dim)
    vmem = pl.BlockSpec(memory_space=pltpu.MemorySpace.VMEM)

    out2 = pl.pallas_call(
        kern,
        out_shape=jax.ShapeDtypeStruct((BN, D), jnp.float32),
        in_specs=[vmem] * 14,       # all stacked weights + data resident in VMEM
        out_specs=vmem,
    )(data2, packed['We'], packed['be'],
      packed['Wqkv'], packed['Wc'], packed['bc'],
      packed['g1'], packed['b1'], packed['W1'], packed['bf1'],
      packed['W2'], packed['bf2'], packed['g2'], packed['b2'])
    return out2.reshape(B, N, D)


# ----------------------------- reference (plain JAX) ------------------------ #

def _ref_forward(data, params, head_num, qkv_dim):
    def bn(a, g, b):
        B, N, D = a.shape
        a2 = a.reshape(B * N, D)
        mean = jnp.mean(a2, axis=0, keepdims=True)
        var = jnp.mean((a2 - mean) ** 2, axis=0, keepdims=True)
        return (((a2 - mean) / jnp.sqrt(var + EPS)) * g + b).reshape(B, N, D)

    x = data @ params['We'] + params['be']
    for p in params['layers']:
        B, N, D = x.shape
        H, dk = head_num, qkv_dim
        q = (x @ p['Wq']).reshape(B, N, H, dk).transpose(0, 2, 1, 3)
        k = (x @ p['Wk']).reshape(B, N, H, dk).transpose(0, 2, 1, 3)
        v = (x @ p['Wv']).reshape(B, N, H, dk).transpose(0, 2, 1, 3)
        score = jnp.einsum('bhnd,bhmd->bhnm', q, k) / math.sqrt(dk)
        w = jax.nn.softmax(score, axis=-1)
        o = jnp.einsum('bhnm,bhmd->bhnd', w, v).transpose(0, 2, 1, 3).reshape(B, N, H * dk)
        mh = o @ p['Wc'] + p['bc']
        out1 = bn(x + mh, p['g1'], p['b1'])
        ff = jnp.maximum(out1 @ p['W1'] + p['bf1'], 0.0) @ p['W2'] + p['bf2']
        x = bn(out1 + ff, p['g2'], p['b2'])
    return x


# ----------------------------- params --------------------------------------- #

def init_params(key, D, H, dk, F, L):
    keys = jax.random.split(key, 2 + L)
    params = {
        'We': jax.random.normal(keys[0], (2, D), jnp.float32) / math.sqrt(2.0),
        'be': jax.random.normal(keys[1], (1, D), jnp.float32) * 0.1,
        'layers': [],
    }
    HD = H * dk
    for l in range(L):
        k = jax.random.split(keys[2 + l], 8)
        params['layers'].append(dict(
            Wq=jax.random.normal(k[0], (D, HD), jnp.float32) / math.sqrt(D),
            Wk=jax.random.normal(k[1], (D, HD), jnp.float32) / math.sqrt(D),
            Wv=jax.random.normal(k[2], (D, HD), jnp.float32) / math.sqrt(D),
            Wc=jax.random.normal(k[3], (HD, D), jnp.float32) / math.sqrt(HD),
            bc=jax.random.normal(k[4], (1, D), jnp.float32) * 0.1,
            g1=jnp.ones((1, D), jnp.float32), b1=jnp.zeros((1, D), jnp.float32),
            W1=jax.random.normal(k[5], (D, F), jnp.float32) / math.sqrt(D),
            bf1=jax.random.normal(k[6], (1, F), jnp.float32) * 0.1,
            W2=jax.random.normal(k[7], (F, D), jnp.float32) / math.sqrt(F),
            bf2=jnp.zeros((1, D), jnp.float32),
            g2=jnp.ones((1, D), jnp.float32), b2=jnp.zeros((1, D), jnp.float32),
        ))
    return params


# ----------------------------- main ------------------------------------------ #

if __name__ == "__main__":
    # model_params (small): embedding_dim=32, head_num=4, qkv_dim=8,
    #                       ff_hidden_dim=64, encoder_layer_num=2
    B, N = 2, 16
    D, H, DK, FF, L = 32, 4, 8, 64, 2

    key = jax.random.PRNGKey(0)
    kd, kp = jax.random.split(key)
    data = jax.random.normal(kd, (B, N, 2), jnp.float32)   # KP items: (weight, value)
    params = init_params(kp, D, H, DK, FF, L)
    packed = pack_params(params)

    out = kp_encoder_forward(data, packed, H, DK)
    out = jax.block_until_ready(out)

    ref = _ref_forward(data, params, H, DK)
    assert out.shape == (B, N, D)
    # Exact-divide softmax + single-pass BN stats: tight tolerance vs. the reference.
    assert jnp.allclose(out, ref, rtol=1e-3, atol=1e-3), "mismatch vs. plain-JAX reference"

    print("KERNEL_OK")
</pallas_src>

<mosaic_0001>
module attributes {stable_mosaic.version = 11 : i64} {
  func.func @fused_encoder_kernel(%arg0: memref<32x2xf32, #tpu.memory_space<vmem>>, %arg1: memref<2x32xf32, #tpu.memory_space<vmem>>, %arg2: memref<1x32xf32, #tpu.memory_space<vmem>>, %arg3: memref<2x32x96xf32, #tpu.memory_space<vmem>>, %arg4: memref<2x32x32xf32, #tpu.memory_space<vmem>>, %arg5: memref<2x1x32xf32, #tpu.memory_space<vmem>>, %arg6: memref<2x1x32xf32, #tpu.memory_space<vmem>>, %arg7: memref<2x1x32xf32, #tpu.memory_space<vmem>>, %arg8: memref<2x32x64xf32, #tpu.memory_space<vmem>>, %arg9: memref<2x1x64xf32, #tpu.memory_space<vmem>>, %arg10: memref<2x64x32xf32, #tpu.memory_space<vmem>>, %arg11: memref<2x1x32xf32, #tpu.memory_space<vmem>>, %arg12: memref<2x1x32xf32, #tpu.memory_space<vmem>>, %arg13: memref<2x1x32xf32, #tpu.memory_space<vmem>>, %arg14: memref<32x32xf32, #tpu.memory_space<vmem>>) attributes {dimension_semantics = [], scalar_prefetch = 0 : i64, scratch_operands = 0 : i64, tpu.core_type = #tpu.core_type<tc>} {
    %c0 = arith.constant 0 : index
    %c0_0 = arith.constant 0 : index
    %0 = vector.load %arg0[%c0, %c0_0] : memref<32x2xf32, #tpu.memory_space<vmem>>, vector<32x2xf32>
    %c0_1 = arith.constant 0 : index
    %c0_2 = arith.constant 0 : index
    %1 = vector.load %arg1[%c0_1, %c0_2] : memref<2x32xf32, #tpu.memory_space<vmem>>, vector<2x32xf32>
    %2 = vector.extract_strided_slice %0 {offsets = [0, 0], sizes = [32, 1], strides = [1, 1]} : vector<32x2xf32> to vector<32x1xf32>
    %3 = vector.extract_strided_slice %1 {offsets = [0, 0], sizes = [1, 32], strides = [1, 1]} : vector<2x32xf32> to vector<1x32xf32>
    %4 = vector.broadcast %2 : vector<32x1xf32> to vector<32x32xf32>
    %5 = vector.broadcast %3 : vector<1x32xf32> to vector<32x32xf32>
    %6 = arith.mulf %4, %5 : vector<32x32xf32>
    %7 = vector.extract_strided_slice %0 {offsets = [0, 1], sizes = [32, 1], strides = [1, 1]} : vector<32x2xf32> to vector<32x1xf32>
    %8 = vector.extract_strided_slice %1 {offsets = [1, 0], sizes = [1, 32], strides = [1, 1]} : vector<2x32xf32> to vector<1x32xf32>
    %9 = vector.broadcast %7 : vector<32x1xf32> to vector<32x32xf32>
    %10 = vector.broadcast %8 : vector<1x32xf32> to vector<32x32xf32>
    %11 = arith.mulf %9, %10 : vector<32x32xf32>
    %12 = arith.addf %6, %11 : vector<32x32xf32>
    %c0_3 = arith.constant 0 : index
    %c0_4 = arith.constant 0 : index
    %13 = vector.load %arg2[%c0_3, %c0_4] : memref<1x32xf32, #tpu.memory_space<vmem>>, vector<1x32xf32>
    %14 = vector.broadcast %13 : vector<1x32xf32> to vector<32x32xf32>
    %15 = arith.addf %12, %14 : vector<32x32xf32>
    %c0_5 = arith.constant 0 : index
    %c0_6 = arith.constant 0 : index
    %c0_7 = arith.constant 0 : index
    %16 = vector.load %arg3[%c0_5, %c0_6, %c0_7] : memref<2x32x96xf32, #tpu.memory_space<vmem>>, vector<1x32x96xf32>
    %17 = vector.shape_cast %16 : vector<1x32x96xf32> to vector<32x96xf32>
    %cst = arith.constant dense<0.000000e+00> : vector<32x96xf32>
    %18 = tpu.matmul %15, %17, %cst {dimension_numbers = #tpu.dot_dimension_numbers<[1], [0], [0], [1], [0, 0, 1, 1], [], []>} : vector<32x32xf32>, vector<32x96xf32>, vector<32x96xf32> -> vector<32x96xf32>
    %19 = vector.extract_strided_slice %18 {offsets = [0, 0], sizes = [32, 32], strides = [1, 1]} : vector<32x96xf32> to vector<32x32xf32>
    %20 = vector.extract_strided_slice %19 {offsets = [0, 0], sizes = [32, 8], strides = [1, 1]} : vector<32x32xf32> to vector<32x8xf32>
    %21 = vector.shape_cast %20 : vector<32x8xf32> to vector<2x16x8xf32>
    %22 = vector.extract_strided_slice %19 {offsets = [0, 8], sizes = [32, 8], strides = [1, 1]} : vector<32x32xf32> to vector<32x8xf32>
    %23 = vector.shape_cast %22 : vector<32x8xf32> to vector<2x16x8xf32>
    %24 = vector.extract_strided_slice %19 {offsets = [0, 16], sizes = [32, 8], strides = [1, 1]} : vector<32x32xf32> to vector<32x8xf32>
    %25 = vector.shape_cast %24 : vector<32x8xf32> to vector<2x16x8xf32>
    %26 = vector.extract_strided_slice %19 {offsets = [0, 24], sizes = [32, 8], strides = [1, 1]} : vector<32x32xf32> to vector<32x8xf32>
    %27 = vector.shape_cast %26 : vector<32x8xf32> to vector<2x16x8xf32>
    %28 = tpu.concatenate %21, %23, %25, %27 in 0 : vector<2x16x8xf32>, vector<2x16x8xf32>, vector<2x16x8xf32>, vector<2x16x8xf32> -> vector<8x16x8xf32>
    %29 = vector.extract_strided_slice %18 {offsets = [0, 32], sizes = [32, 32], strides = [1, 1]} : vector<32x96xf32> to vector<32x32xf32>
    %30 = vector.extract_strided_slice %29 {offsets = [0, 0], sizes = [32, 8], strides = [1, 1]} : vector<32x32xf32> to vector<32x8xf32>
    %31 = vector.shape_cast %30 : vector<32x8xf32> to vector<2x16x8xf32>
    %32 = vector.extract_strided_slice %29 {offsets = [0, 8], sizes = [32, 8], strides = [1, 1]} : vector<32x32xf32> to vector<32x8xf32>
    %33 = vector.shape_cast %32 : vector<32x8xf32> to vector<2x16x8xf32>
    %34 = vector.extract_strided_slice %29 {offsets = [0, 16], sizes = [32, 8], strides = [1, 1]} : vector<32x32xf32> to vector<32x8xf32>
    %35 = vector.shape_cast %34 : vector<32x8xf32> to vector<2x16x8xf32>
    %36 = vector.extract_strided_slice %29 {offsets = [0, 24], sizes = [32, 8], strides = [1, 1]} : vector<32x32xf32> to vector<32x8xf32>
    %37 = vector.shape_cast %36 : vector<32x8xf32> to vector<2x16x8xf32>
    %38 = tpu.concatenate %31, %33, %35, %37 in 0 : vector<2x16x8xf32>, vector<2x16x8xf32>, vector<2x16x8xf32>, vector<2x16x8xf32> -> vector<8x16x8xf32>
    %39 = vector.extract_strided_slice %18 {offsets = [0, 64], sizes = [32, 32], strides = [1, 1]} : vector<32x96xf32> to vector<32x32xf32>
    %40 = vector.extract_strided_slice %39 {offsets = [0, 0], sizes = [32, 8], strides = [1, 1]} : vector<32x32xf32> to vector<32x8xf32>
    %41 = vector.shape_cast %40 : vector<32x8xf32> to vector<2x16x8xf32>
    %42 = vector.extract_strided_slice %39 {offsets = [0, 8], sizes = [32, 8], strides = [1, 1]} : vector<32x32xf32> to vector<32x8xf32>
    %43 = vector.shape_cast %42 : vector<32x8xf32> to vector<2x16x8xf32>
    %44 = vector.extract_strided_slice %39 {offsets = [0, 16], sizes = [32, 8], strides = [1, 1]} : vector<32x32xf32> to vector<32x8xf32>
    %45 = vector.shape_cast %44 : vector<32x8xf32> to vector<2x16x8xf32>
    %46 = vector.extract_strided_slice %39 {offsets = [0, 24], sizes = [32, 8], strides = [1, 1]} : vector<32x32xf32> to vector<32x8xf32>
    %47 = vector.shape_cast %46 : vector<32x8xf32> to vector<2x16x8xf32>
    %48 = tpu.concatenate %41, %43, %45, %47 in 0 : vector<2x16x8xf32>, vector<2x16x8xf32>, vector<2x16x8xf32>, vector<2x16x8xf32> -> vector<8x16x8xf32>
    "tpu.trace_start"() <{level = 10 : i32, message = "gnd,gmd->gnm"}> : () -> ()
    %cst_8 = arith.constant dense<0.000000e+00> : vector<8x16x16xf32>
    %49 = tpu.matmul %28, %38, %cst_8 {dimension_numbers = #tpu.dot_dimension_numbers<[2], [2], [1], [1], [0, 0, 0, 1, 1, 1], [0], [0]>} : vector<8x16x8xf32>, vector<8x16x8xf32>, vector<8x16x16xf32> -> vector<8x16x16xf32>
    "tpu.trace_stop"() : () -> ()
    %cst_9 = arith.constant 0.353553385 : f32
    %50 = vector.broadcast %cst_9 : f32 to vector<8x16x16xf32>
    %51 = arith.mulf %49, %50 : vector<8x16x16xf32>
    %cst_10 = arith.constant dense<0xFF800000> : vector<8x16xf32>
    %52 = vector.multi_reduction <maximumf>, %51, %cst_10 [2] : vector<8x16x16xf32> to vector<8x16xf32>
    %53 = vector.shape_cast %52 : vector<8x16xf32> to vector<8x16x1xf32>
    %54 = vector.broadcast %53 : vector<8x16x1xf32> to vector<8x16x16xf32>
    %55 = arith.subf %51, %54 : vector<8x16x16xf32>
    %56 = math.exp %55 : vector<8x16x16xf32>
    %cst_11 = arith.constant dense<0.000000e+00> : vector<8x16xf32>
    %57 = vector.multi_reduction <add>, %56, %cst_11 [2] : vector<8x16x16xf32> to vector<8x16xf32>
    %58 = vector.shape_cast %57 : vector<8x16xf32> to vector<8x16x1xf32>
    %59 = vector.broadcast %58 : vector<8x16x1xf32> to vector<8x16x16xf32>
    %60 = arith.divf %56, %59 : vector<8x16x16xf32>
    "tpu.trace_start"() <{level = 10 : i32, message = "gnm,gmd->gnd"}> : () -> ()
    %cst_12 = arith.constant dense<0.000000e+00> : vector<8x16x8xf32>
    %61 = tpu.matmul %60, %48, %cst_12 {dimension_numbers = #tpu.dot_dimension_numbers<[2], [1], [1], [2], [0, 0, 0, 1, 1, 2], [0], [0]>} : vector<8x16x16xf32>, vector<8x16x8xf32>, vector<8x16x8xf32> -> vector<8x16x8xf32>
    "tpu.trace_stop"() : () -> ()
    %62 = vector.shape_cast %61 : vector<8x16x8xf32> to vector<4x32x8xf32>
    %63 = vector.extract_strided_slice %62 {offsets = [0, 0, 0], sizes = [1, 32, 8], strides = [1, 1, 1]} : vector<4x32x8xf32> to vector<1x32x8xf32>
    %64 = vector.shape_cast %63 : vector<1x32x8xf32> to vector<32x8xf32>
    %65 = vector.extract_strided_slice %62 {offsets = [1, 0, 0], sizes = [1, 32, 8], strides = [1, 1, 1]} : vector<4x32x8xf32> to vector<1x32x8xf32>
    %66 = vector.shape_cast %65 : vector<1x32x8xf32> to vector<32x8xf32>
    %67 = vector.extract_strided_slice %62 {offsets = [2, 0, 0], sizes = [1, 32, 8], strides = [1, 1, 1]} : vector<4x32x8xf32> to vector<1x32x8xf32>
    %68 = vector.shape_cast %67 : vector<1x32x8xf32> to vector<32x8xf32>
    %69 = vector.extract_strided_slice %62 {offsets = [3, 0, 0], sizes = [1, 32, 8], strides = [1, 1, 1]} : vector<4x32x8xf32> to vector<1x32x8xf32>
    %70 = vector.shape_cast %69 : vector<1x32x8xf32> to vector<32x8xf32>
    %71 = tpu.concatenate %64, %66, %68, %70 in 1 : vector<32x8xf32>, vector<32x8xf32>, vector<32x8xf32>, vector<32x8xf32> -> vector<32x32xf32>
    %c0_13 = arith.constant 0 : index
    %c0_14 = arith.constant 0 : index
    %c0_15 = arith.constant 0 : index
    %72 = vector.load %arg4[%c0_13, %c0_14, %c0_15] : memref<2x32x32xf32, #tpu.memory_space<vmem>>, vector<1x32x32xf32>
    %73 = vector.shape_cast %72 : vector<1x32x32xf32> to vector<32x32xf32>
    %cst_16 = arith.constant dense<0.000000e+00> : vector<32x32xf32>
    %74 = tpu.matmul %71, %73, %cst_16 {dimension_numbers = #tpu.dot_dimension_numbers<[1], [0], [0], [1], [0, 0, 1, 1], [], []>} : vector<32x32xf32>, vector<32x32xf32>, vector<32x32xf32> -> vector<32x32xf32>
    %c0_17 = arith.constant 0 : index
    %c0_18 = arith.constant 0 : index
    %c0_19 = arith.constant 0 : index
    %75 = vector.load %arg5[%c0_17, %c0_18, %c0_19] : memref<2x1x32xf32, #tpu.memory_space<vmem>>, vector<1x1x32xf32>
    %76 = vector.shape_cast %75 : vector<1x1x32xf32> to vector<1x32xf32>
    %77 = vector.broadcast %76 : vector<1x32xf32> to vector<32x32xf32>
    %78 = arith.addf %74, %77 : vector<32x32xf32>
    %79 = arith.addf %15, %78 : vector<32x32xf32>
    %c0_20 = arith.constant 0 : index
    %c0_21 = arith.constant 0 : index
    %c0_22 = arith.constant 0 : index
    %80 = vector.load %arg6[%c0_20, %c0_21, %c0_22] : memref<2x1x32xf32, #tpu.memory_space<vmem>>, vector<1x1x32xf32>
    %81 = vector.shape_cast %80 : vector<1x1x32xf32> to vector<1x32xf32>
    %c0_23 = arith.constant 0 : index
    %c0_24 = arith.constant 0 : index
    %c0_25 = arith.constant 0 : index
    %82 = vector.load %arg7[%c0_23, %c0_24, %c0_25] : memref<2x1x32xf32, #tpu.memory_space<vmem>>, vector<1x1x32xf32>
    %83 = vector.shape_cast %82 : vector<1x1x32xf32> to vector<1x32xf32>
    %cst_26 = arith.constant dense<0.000000e+00> : vector<32xf32>
    %84 = vector.multi_reduction <add>, %79, %cst_26 [0] : vector<32x32xf32> to vector<32xf32>
    %85 = vector.shape_cast %84 : vector<32xf32> to vector<1x32xf32>
    %cst_27 = arith.constant 3.200000e+01 : f32
    %86 = vector.broadcast %cst_27 : f32 to vector<1x32xf32>
    %87 = arith.divf %85, %86 : vector<1x32xf32>
    %88 = arith.mulf %79, %79 : vector<32x32xf32>
    %cst_28 = arith.constant dense<0.000000e+00> : vector<32xf32>
    %89 = vector.multi_reduction <add>, %88, %cst_28 [0] : vector<32x32xf32> to vector<32xf32>
    %90 = vector.shape_cast %89 : vector<32xf32> to vector<1x32xf32>
    %cst_29 = arith.constant 3.200000e+01 : f32
    %91 = vector.broadcast %cst_29 : f32 to vector<1x32xf32>
    %92 = arith.divf %90, %91 : vector<1x32xf32>
    %93 = arith.mulf %87, %87 : vector<1x32xf32>
    %94 = arith.subf %92, %93 : vector<1x32xf32>
    %95 = vector.broadcast %87 : vector<1x32xf32> to vector<32x32xf32>
    %96 = arith.subf %79, %95 : vector<32x32xf32>
    %cst_30 = arith.constant 9.99999974E-6 : f32
    %97 = vector.broadcast %cst_30 : f32 to vector<1x32xf32>
    %98 = arith.addf %94, %97 : vector<1x32xf32>
    %99 = math.rsqrt %98 : vector<1x32xf32>
    %100 = vector.broadcast %99 : vector<1x32xf32> to vector<32x32xf32>
    %101 = arith.mulf %96, %100 : vector<32x32xf32>
    %102 = vector.broadcast %81 : vector<1x32xf32> to vector<32x32xf32>
    %103 = arith.mulf %101, %102 : vector<32x32xf32>
    %104 = vector.broadcast %83 : vector<1x32xf32> to vector<32x32xf32>
    %105 = arith.addf %103, %104 : vector<32x32xf32>
    %c0_31 = arith.constant 0 : index
    %c0_32 = arith.constant 0 : index
    %c0_33 = arith.constant 0 : index
    %106 = vector.load %arg8[%c0_31, %c0_32, %c0_33] : memref<2x32x64xf32, #tpu.memory_space<vmem>>, vector<1x32x64xf32>
    %107 = vector.shape_cast %106 : vector<1x32x64xf32> to vector<32x64xf32>
    %cst_34 = arith.constant dense<0.000000e+00> : vector<32x64xf32>
    %108 = tpu.matmul %105, %107, %cst_34 {dimension_numbers = #tpu.dot_dimension_numbers<[1], [0], [0], [1], [0, 0, 1, 1], [], []>} : vector<32x32xf32>, vector<32x64xf32>, vector<32x64xf32> -> vector<32x64xf32>
    %c0_35 = arith.constant 0 : index
    %c0_36 = arith.constant 0 : index
    %c0_37 = arith.constant 0 : index
    %109 = vector.load %arg9[%c0_35, %c0_36, %c0_37] : memref<2x1x64xf32, #tpu.memory_space<vmem>>, vector<1x1x64xf32>
    %110 = vector.shape_cast %109 : vector<1x1x64xf32> to vector<1x64xf32>
    %111 = vector.broadcast %110 : vector<1x64xf32> to vector<32x64xf32>
    %112 = arith.addf %108, %111 : vector<32x64xf32>
    %cst_38 = arith.constant 0.000000e+00 : f32
    %113 = vector.broadcast %cst_38 : f32 to vector<32x64xf32>
    %114 = arith.maximumf %112, %113 : vector<32x64xf32>
    %c0_39 = arith.constant 0 : index
    %c0_40 = arith.constant 0 : index
    %c0_41 = arith.constant 0 : index
    %115 = vector.load %arg10[%c0_39, %c0_40, %c0_41] : memref<2x64x32xf32, #tpu.memory_space<vmem>>, vector<1x64x32xf32>
    %116 = vector.shape_cast %115 : vector<1x64x32xf32> to vector<64x32xf32>
    %cst_42 = arith.constant dense<0.000000e+00> : vector<32x32xf32>
    %117 = tpu.matmul %114, %116, %cst_42 {dimension_numbers = #tpu.dot_dimension_numbers<[1], [0], [0], [1], [0, 0, 1, 1], [], []>} : vector<32x64xf32>, vector<64x32xf32>, vector<32x32xf32> -> vector<32x32xf32>
    %c0_43 = arith.constant 0 : index
    %c0_44 = arith.constant 0 : index
    %c0_45 = arith.constant 0 : index
    %118 = vector.load %arg11[%c0_43, %c0_44, %c0_45] : memref<2x1x32xf32, #tpu.memory_space<vmem>>, vector<1x1x32xf32>
    %119 = vector.shape_cast %118 : vector<1x1x32xf32> to vector<1x32xf32>
    %120 = vector.broadcast %119 : vector<1x32xf32> to vector<32x32xf32>
    %121 = arith.addf %117, %120 : vector<32x32xf32>
    %122 = arith.addf %105, %121 : vector<32x32xf32>
    %c0_46 = arith.constant 0 : index
    %c0_47 = arith.constant 0 : index
    %c0_48 = arith.constant 0 : index
    %123 = vector.load %arg12[%c0_46, %c0_47, %c0_48] : memref<2x1x32xf32, #tpu.memory_space<vmem>>, vector<1x1x32xf32>
    %124 = vector.shape_cast %123 : vector<1x1x32xf32> to vector<1x32xf32>
    %c0_49 = arith.constant 0 : index
    %c0_50 = arith.constant 0 : index
    %c0_51 = arith.constant 0 : index
    %125 = vector.load %arg13[%c0_49, %c0_50, %c0_51] : memref<2x1x32xf32, #tpu.memory_space<vmem>>, vector<1x1x32xf32>
    %126 = vector.shape_cast %125 : vector<1x1x32xf32> to vector<1x32xf32>
    %cst_52 = arith.constant dense<0.000000e+00> : vector<32xf32>
    %127 = vector.multi_reduction <add>, %122, %cst_52 [0] : vector<32x32xf32> to vector<32xf32>
    %128 = vector.shape_cast %127 : vector<32xf32> to vector<1x32xf32>
    %cst_53 = arith.constant 3.200000e+01 : f32
    %129 = vector.broadcast %cst_53 : f32 to vector<1x32xf32>
    %130 = arith.divf %128, %129 : vector<1x32xf32>
    %131 = arith.mulf %122, %122 : vector<32x32xf32>
    %cst_54 = arith.constant dense<0.000000e+00> : vector<32xf32>
    %132 = vector.multi_reduction <add>, %131, %cst_54 [0] : vector<32x32xf32> to vector<32xf32>
    %133 = vector.shape_cast %132 : vector<32xf32> to vector<1x32xf32>
    %cst_55 = arith.constant 3.200000e+01 : f32
    %134 = vector.broadcast %cst_55 : f32 to vector<1x32xf32>
    %135 = arith.divf %133, %134 : vector<1x32xf32>
    %136 = arith.mulf %130, %130 : vector<1x32xf32>
    %137 = arith.subf %135, %136 : vector<1x32xf32>
    %138 = vector.broadcast %130 : vector<1x32xf32> to vector<32x32xf32>
    %139 = arith.subf %122, %138 : vector<32x32xf32>
    %cst_56 = arith.constant 9.99999974E-6 : f32
    %140 = vector.broadcast %cst_56 : f32 to vector<1x32xf32>
    %141 = arith.addf %137, %140 : vector<1x32xf32>
    %142 = math.rsqrt %141 : vector<1x32xf32>
    %143 = vector.broadcast %142 : vector<1x32xf32> to vector<32x32xf32>
    %144 = arith.mulf %139, %143 : vector<32x32xf32>
    %145 = vector.broadcast %124 : vector<1x32xf32> to vector<32x32xf32>
    %146 = arith.mulf %144, %145 : vector<32x32xf32>
    %147 = vector.broadcast %126 : vector<1x32xf32> to vector<32x32xf32>
    %148 = arith.addf %146, %147 : vector<32x32xf32>
    %c1 = arith.constant 1 : index
    %c0_57 = arith.constant 0 : index
    %c0_58 = arith.constant 0 : index
    %149 = vector.load %arg3[%c1, %c0_57, %c0_58] : memref<2x32x96xf32, #tpu.memory_space<vmem>>, vector<1x32x96xf32>
    %150 = vector.shape_cast %149 : vector<1x32x96xf32> to vector<32x96xf32>
    %cst_59 = arith.constant dense<0.000000e+00> : vector<32x96xf32>
    %151 = tpu.matmul %148, %150, %cst_59 {dimension_numbers = #tpu.dot_dimension_numbers<[1], [0], [0], [1], [0, 0, 1, 1], [], []>} : vector<32x32xf32>, vector<32x96xf32>, vector<32x96xf32> -> vector<32x96xf32>
    %152 = vector.extract_strided_slice %151 {offsets = [0, 0], sizes = [32, 32], strides = [1, 1]} : vector<32x96xf32> to vector<32x32xf32>
    %153 = vector.extract_strided_slice %152 {offsets = [0, 0], sizes = [32, 8], strides = [1, 1]} : vector<32x32xf32> to vector<32x8xf32>
    %154 = vector.shape_cast %153 : vector<32x8xf32> to vector<2x16x8xf32>
    %155 = vector.extract_strided_slice %152 {offsets = [0, 8], sizes = [32, 8], strides = [1, 1]} : vector<32x32xf32> to vector<32x8xf32>
    %156 = vector.shape_cast %155 : vector<32x8xf32> to vector<2x16x8xf32>
    %157 = vector.extract_strided_slice %152 {offsets = [0, 16], sizes = [32, 8], strides = [1, 1]} : vector<32x32xf32> to vector<32x8xf32>
    %158 = vector.shape_cast %157 : vector<32x8xf32> to vector<2x16x8xf32>
    %159 = vector.extract_strided_slice %152 {offsets = [0, 24], sizes = [32, 8], strides = [1, 1]} : vector<32x32xf32> to vector<32x8xf32>
    %160 = vector.shape_cast %159 : vector<32x8xf32> to vector<2x16x8xf32>
    %161 = tpu.concatenate %154, %156, %158, %160 in 0 : vector<2x16x8xf32>, vector<2x16x8xf32>, vector<2x16x8xf32>, vector<2x16x8xf32> -> vector<8x16x8xf32>
    %162 = vector.extract_strided_slice %151 {offsets = [0, 32], sizes = [32, 32], strides = [1, 1]} : vector<32x96xf32> to vector<32x32xf32>
    %163 = vector.extract_strided_slice %162 {offsets = [0, 0], sizes = [32, 8], strides = [1, 1]} : vector<32x32xf32> to vector<32x8xf32>
    %164 = vector.shape_cast %163 : vector<32x8xf32> to vector<2x16x8xf32>
    %165 = vector.extract_strided_slice %162 {offsets = [0, 8], sizes = [32, 8], strides = [1, 1]} : vector<32x32xf32> to vector<32x8xf32>
    %166 = vector.shape_cast %165 : vector<32x8xf32> to vector<2x16x8xf32>
    %167 = vector.extract_strided_slice %162 {offsets = [0, 16], sizes = [32, 8], strides = [1, 1]} : vector<32x32xf32> to vector<32x8xf32>
    %168 = vector.shape_cast %167 : vector<32x8xf32> to vector<2x16x8xf32>
    %169 = vector.extract_strided_slice %162 {offsets = [0, 24], sizes = [32, 8], strides = [1, 1]} : vector<32x32xf32> to vector<32x8xf32>
    %170 = vector.shape_cast %169 : vector<32x8xf32> to vector<2x16x8xf32>
    %171 = tpu.concatenate %164, %166, %168, %170 in 0 : vector<2x16x8xf32>, vector<2x16x8xf32>, vector<2x16x8xf32>, vector<2x16x8xf32> -> vector<8x16x8xf32>
    %172 = vector.extract_strided_slice %151 {offsets = [0, 64], sizes = [32, 32], strides = [1, 1]} : vector<32x96xf32> to vector<32x32xf32>
    %173 = vector.extract_strided_slice %172 {offsets = [0, 0], sizes = [32, 8], strides = [1, 1]} : vector<32x32xf32> to vector<32x8xf32>
    %174 = vector.shape_cast %173 : vector<32x8xf32> to vector<2x16x8xf32>
    %175 = vector.extract_strided_slice %172 {offsets = [0, 8], sizes = [32, 8], strides = [1, 1]} : vector<32x32xf32> to vector<32x8xf32>
    %176 = vector.shape_cast %175 : vector<32x8xf32> to vector<2x16x8xf32>
    %177 = vector.extract_strided_slice %172 {offsets = [0, 16], sizes = [32, 8], strides = [1, 1]} : vector<32x32xf32> to vector<32x8xf32>
    %178 = vector.shape_cast %177 : vector<32x8xf32> to vector<2x16x8xf32>
    %179 = vector.extract_strided_slice %172 {offsets = [0, 24], sizes = [32, 8], strides = [1, 1]} : vector<32x32xf32> to vector<32x8xf32>
    %180 = vector.shape_cast %179 : vector<32x8xf32> to vector<2x16x8xf32>
    %181 = tpu.concatenate %174, %176, %178, %180 in 0 : vector<2x16x8xf32>, vector<2x16x8xf32>, vector<2x16x8xf32>, vector<2x16x8xf32> -> vector<8x16x8xf32>
    "tpu.trace_start"() <{level = 10 : i32, message = "gnd,gmd->gnm"}> : () -> ()
    %cst_60 = arith.constant dense<0.000000e+00> : vector<8x16x16xf32>
    %182 = tpu.matmul %161, %171, %cst_60 {dimension_numbers = #tpu.dot_dimension_numbers<[2], [2], [1], [1], [0, 0, 0, 1, 1, 1], [0], [0]>} : vector<8x16x8xf32>, vector<8x16x8xf32>, vector<8x16x16xf32> -> vector<8x16x16xf32>
    "tpu.trace_stop"() : () -> ()
    %cst_61 = arith.constant 0.353553385 : f32
    %183 = vector.broadcast %cst_61 : f32 to vector<8x16x16xf32>
    %184 = arith.mulf %182, %183 : vector<8x16x16xf32>
    %cst_62 = arith.constant dense<0xFF800000> : vector<8x16xf32>
    %185 = vector.multi_reduction <maximumf>, %184, %cst_62 [2] : vector<8x16x16xf32> to vector<8x16xf32>
    %186 = vector.shape_cast %185 : vector<8x16xf32> to vector<8x16x1xf32>
    %187 = vector.broadcast %186 : vector<8x16x1xf32> to vector<8x16x16xf32>
    %188 = arith.subf %184, %187 : vector<8x16x16xf32>
    %189 = math.exp %188 : vector<8x16x16xf32>
    %cst_63 = arith.constant dense<0.000000e+00> : vector<8x16xf32>
    %190 = vector.multi_reduction <add>, %189, %cst_63 [2] : vector<8x16x16xf32> to vector<8x16xf32>
    %191 = vector.shape_cast %190 : vector<8x16xf32> to vector<8x16x1xf32>
    %192 = vector.broadcast %191 : vector<8x16x1xf32> to vector<8x16x16xf32>
    %193 = arith.divf %189, %192 : vector<8x16x16xf32>
    "tpu.trace_start"() <{level = 10 : i32, message = "gnm,gmd->gnd"}> : () -> ()
    %cst_64 = arith.constant dense<0.000000e+00> : vector<8x16x8xf32>
    %194 = tpu.matmul %193, %181, %cst_64 {dimension_numbers = #tpu.dot_dimension_numbers<[2], [1], [1], [2], [0, 0, 0, 1, 1, 2], [0], [0]>} : vector<8x16x16xf32>, vector<8x16x8xf32>, vector<8x16x8xf32> -> vector<8x16x8xf32>
    "tpu.trace_stop"() : () -> ()
    %195 = vector.shape_cast %194 : vector<8x16x8xf32> to vector<4x32x8xf32>
    %196 = vector.extract_strided_slice %195 {offsets = [0, 0, 0], sizes = [1, 32, 8], strides = [1, 1, 1]} : vector<4x32x8xf32> to vector<1x32x8xf32>
    %197 = vector.shape_cast %196 : vector<1x32x8xf32> to vector<32x8xf32>
    %198 = vector.extract_strided_slice %195 {offsets = [1, 0, 0], sizes = [1, 32, 8], strides = [1, 1, 1]} : vector<4x32x8xf32> to vector<1x32x8xf32>
    %199 = vector.shape_cast %198 : vector<1x32x8xf32> to vector<32x8xf32>
    %200 = vector.extract_strided_slice %195 {offsets = [2, 0, 0], sizes = [1, 32, 8], strides = [1, 1, 1]} : vector<4x32x8xf32> to vector<1x32x8xf32>
    %201 = vector.shape_cast %200 : vector<1x32x8xf32> to vector<32x8xf32>
    %202 = vector.extract_strided_slice %195 {offsets = [3, 0, 0], sizes = [1, 32, 8], strides = [1, 1, 1]} : vector<4x32x8xf32> to vector<1x32x8xf32>
    %203 = vector.shape_cast %202 : vector<1x32x8xf32> to vector<32x8xf32>
    %204 = tpu.concatenate %197, %199, %201, %203 in 1 : vector<32x8xf32>, vector<32x8xf32>, vector<32x8xf32>, vector<32x8xf32> -> vector<32x32xf32>
    %c1_65 = arith.constant 1 : index
    %c0_66 = arith.constant 0 : index
    %c0_67 = arith.constant 0 : index
    %205 = vector.load %arg4[%c1_65, %c0_66, %c0_67] : memref<2x32x32xf32, #tpu.memory_space<vmem>>, vector<1x32x32xf32>
    %206 = vector.shape_cast %205 : vector<1x32x32xf32> to vector<32x32xf32>
    %cst_68 = arith.constant dense<0.000000e+00> : vector<32x32xf32>
    %207 = tpu.matmul %204, %206, %cst_68 {dimension_numbers = #tpu.dot_dimension_numbers<[1], [0], [0], [1], [0, 0, 1, 1], [], []>} : vector<32x32xf32>, vector<32x32xf32>, vector<32x32xf32> -> vector<32x32xf32>
    %c1_69 = arith.constant 1 : index
    %c0_70 = arith.constant 0 : index
    %c0_71 = arith.constant 0 : index
    %208 = vector.load %arg5[%c1_69, %c0_70, %c0_71] : memref<2x1x32xf32, #tpu.memory_space<vmem>>, vector<1x1x32xf32>
    %209 = vector.shape_cast %208 : vector<1x1x32xf32> to vector<1x32xf32>
    %210 = vector.broadcast %209 : vector<1x32xf32> to vector<32x32xf32>
    %211 = arith.addf %207, %210 : vector<32x32xf32>
    %212 = arith.addf %148, %211 : vector<32x32xf32>
    %c1_72 = arith.constant 1 : index
    %c0_73 = arith.constant 0 : index
    %c0_74 = arith.constant 0 : index
    %213 = vector.load %arg6[%c1_72, %c0_73, %c0_74] : memref<2x1x32xf32, #tpu.memory_space<vmem>>, vector<1x1x32xf32>
    %214 = vector.shape_cast %213 : vector<1x1x32xf32> to vector<1x32xf32>
    %c1_75 = arith.constant 1 : index
    %c0_76 = arith.constant 0 : index
    %c0_77 = arith.constant 0 : index
    %215 = vector.load %arg7[%c1_75, %c0_76, %c0_77] : memref<2x1x32xf32, #tpu.memory_space<vmem>>, vector<1x1x32xf32>
    %216 = vector.shape_cast %215 : vector<1x1x32xf32> to vector<1x32xf32>
    %cst_78 = arith.constant dense<0.000000e+00> : vector<32xf32>
    %217 = vector.multi_reduction <add>, %212, %cst_78 [0] : vector<32x32xf32> to vector<32xf32>
    %218 = vector.shape_cast %217 : vector<32xf32> to vector<1x32xf32>
    %cst_79 = arith.constant 3.200000e+01 : f32
    %219 = vector.broadcast %cst_79 : f32 to vector<1x32xf32>
    %220 = arith.divf %218, %219 : vector<1x32xf32>
    %221 = arith.mulf %212, %212 : vector<32x32xf32>
    %cst_80 = arith.constant dense<0.000000e+00> : vector<32xf32>
    %222 = vector.multi_reduction <add>, %221, %cst_80 [0] : vector<32x32xf32> to vector<32xf32>
    %223 = vector.shape_cast %222 : vector<32xf32> to vector<1x32xf32>
    %cst_81 = arith.constant 3.200000e+01 : f32
    %224 = vector.broadcast %cst_81 : f32 to vector<1x32xf32>
    %225 = arith.divf %223, %224 : vector<1x32xf32>
    %226 = arith.mulf %220, %220 : vector<1x32xf32>
    %227 = arith.subf %225, %226 : vector<1x32xf32>
    %228 = vector.broadcast %220 : vector<1x32xf32> to vector<32x32xf32>
    %229 = arith.subf %212, %228 : vector<32x32xf32>
    %cst_82 = arith.constant 9.99999974E-6 : f32
    %230 = vector.broadcast %cst_82 : f32 to vector<1x32xf32>
    %231 = arith.addf %227, %230 : vector<1x32xf32>
    %232 = math.rsqrt %231 : vector<1x32xf32>
    %233 = vector.broadcast %232 : vector<1x32xf32> to vector<32x32xf32>
    %234 = arith.mulf %229, %233 : vector<32x32xf32>
    %235 = vector.broadcast %214 : vector<1x32xf32> to vector<32x32xf32>
    %236 = arith.mulf %234, %235 : vector<32x32xf32>
    %237 = vector.broadcast %216 : vector<1x32xf32> to vector<32x32xf32>
    %238 = arith.addf %236, %237 : vector<32x32xf32>
    %c1_83 = arith.constant 1 : index
    %c0_84 = arith.constant 0 : index
    %c0_85 = arith.constant 0 : index
    %239 = vector.load %arg8[%c1_83, %c0_84, %c0_85] : memref<2x32x64xf32, #tpu.memory_space<vmem>>, vector<1x32x64xf32>
    %240 = vector.shape_cast %239 : vector<1x32x64xf32> to vector<32x64xf32>
    %cst_86 = arith.constant dense<0.000000e+00> : vector<32x64xf32>
    %241 = tpu.matmul %238, %240, %cst_86 {dimension_numbers = #tpu.dot_dimension_numbers<[1], [0], [0], [1], [0, 0, 1, 1], [], []>} : vector<32x32xf32>, vector<32x64xf32>, vector<32x64xf32> -> vector<32x64xf32>
    %c1_87 = arith.constant 1 : index
    %c0_88 = arith.constant 0 : index
    %c0_89 = arith.constant 0 : index
    %242 = vector.load %arg9[%c1_87, %c0_88, %c0_89] : memref<2x1x64xf32, #tpu.memory_space<vmem>>, vector<1x1x64xf32>
    %243 = vector.shape_cast %242 : vector<1x1x64xf32> to vector<1x64xf32>
    %244 = vector.broadcast %243 : vector<1x64xf32> to vector<32x64xf32>
    %245 = arith.addf %241, %244 : vector<32x64xf32>
    %cst_90 = arith.constant 0.000000e+00 : f32
    %246 = vector.broadcast %cst_90 : f32 to vector<32x64xf32>
    %247 = arith.maximumf %245, %246 : vector<32x64xf32>
    %c1_91 = arith.constant 1 : index
    %c0_92 = arith.constant 0 : index
    %c0_93 = arith.constant 0 : index
    %248 = vector.load %arg10[%c1_91, %c0_92, %c0_93] : memref<2x64x32xf32, #tpu.memory_space<vmem>>, vector<1x64x32xf32>
    %249 = vector.shape_cast %248 : vector<1x64x32xf32> to vector<64x32xf32>
    %cst_94 = arith.constant dense<0.000000e+00> : vector<32x32xf32>
    %250 = tpu.matmul %247, %249, %cst_94 {dimension_numbers = #tpu.dot_dimension_numbers<[1], [0], [0], [1], [0, 0, 1, 1], [], []>} : vector<32x64xf32>, vector<64x32xf32>, vector<32x32xf32> -> vector<32x32xf32>
    %c1_95 = arith.constant 1 : index
    %c0_96 = arith.constant 0 : index
    %c0_97 = arith.constant 0 : index
    %251 = vector.load %arg11[%c1_95, %c0_96, %c0_97] : memref<2x1x32xf32, #tpu.memory_space<vmem>>, vector<1x1x32xf32>
    %252 = vector.shape_cast %251 : vector<1x1x32xf32> to vector<1x32xf32>
    %253 = vector.broadcast %252 : vector<1x32xf32> to vector<32x32xf32>
    %254 = arith.addf %250, %253 : vector<32x32xf32>
    %255 = arith.addf %238, %254 : vector<32x32xf32>
    %c1_98 = arith.constant 1 : index
    %c0_99 = arith.constant 0 : index
    %c0_100 = arith.constant 0 : index
    %256 = vector.load %arg12[%c1_98, %c0_99, %c0_100] : memref<2x1x32xf32, #tpu.memory_space<vmem>>, vector<1x1x32xf32>
    %257 = vector.shape_cast %256 : vector<1x1x32xf32> to vector<1x32xf32>
    %c1_101 = arith.constant 1 : index
    %c0_102 = arith.constant 0 : index
    %c0_103 = arith.constant 0 : index
    %258 = vector.load %arg13[%c1_101, %c0_102, %c0_103] : memref<2x1x32xf32, #tpu.memory_space<vmem>>, vector<1x1x32xf32>
    %259 = vector.shape_cast %258 : vector<1x1x32xf32> to vector<1x32xf32>
    %cst_104 = arith.constant dense<0.000000e+00> : vector<32xf32>
    %260 = vector.multi_reduction <add>, %255, %cst_104 [0] : vector<32x32xf32> to vector<32xf32>
    %261 = vector.shape_cast %260 : vector<32xf32> to vector<1x32xf32>
    %cst_105 = arith.constant 3.200000e+01 : f32
    %262 = vector.broadcast %cst_105 : f32 to vector<1x32xf32>
    %263 = arith.divf %261, %262 : vector<1x32xf32>
    %264 = arith.mulf %255, %255 : vector<32x32xf32>
    %cst_106 = arith.constant dense<0.000000e+00> : vector<32xf32>
    %265 = vector.multi_reduction <add>, %264, %cst_106 [0] : vector<32x32xf32> to vector<32xf32>
    %266 = vector.shape_cast %265 : vector<32xf32> to vector<1x32xf32>
    %cst_107 = arith.constant 3.200000e+01 : f32
    %267 = vector.broadcast %cst_107 : f32 to vector<1x32xf32>
    %268 = arith.divf %266, %267 : vector<1x32xf32>
    %269 = arith.mulf %263, %263 : vector<1x32xf32>
    %270 = arith.subf %268, %269 : vector<1x32xf32>
    %271 = vector.broadcast %263 : vector<1x32xf32> to vector<32x32xf32>
    %272 = arith.subf %255, %271 : vector<32x32xf32>
    %cst_108 = arith.constant 9.99999974E-6 : f32
    %273 = vector.broadcast %cst_108 : f32 to vector<1x32xf32>
    %274 = arith.addf %270, %273 : vector<1x32xf32>
    %275 = math.rsqrt %274 : vector<1x32xf32>
    %276 = vector.broadcast %275 : vector<1x32xf32> to vector<32x32xf32>
    %277 = arith.mulf %272, %276 : vector<32x32xf32>
    %278 = vector.broadcast %257 : vector<1x32xf32> to vector<32x32xf32>
    %279 = arith.mulf %277, %278 : vector<32x32xf32>
    %280 = vector.broadcast %259 : vector<1x32xf32> to vector<32x32xf32>
    %281 = arith.addf %279, %280 : vector<32x32xf32>
    %c0_109 = arith.constant 0 : index
    %c0_110 = arith.constant 0 : index
    %282 = vector.load %arg14[%c0_109, %c0_110] : memref<32x32xf32, #tpu.memory_space<vmem>>, vector<32x32xf32>
    tpu.vector_store %arg14[%c0_109, %c0_110], %281 {strides = array<i32>} : memref<32x32xf32, #tpu.memory_space<vmem>>, vector<32x32xf32>,
    return
  }
}

</mosaic_0001>

<bundles_post_ra>
// kernel: tpu_custom_call.1
= control target key start
LH: loop header
LB: loop body
LE: loop exit
PB: predicated region body
PF: predicated region fallthrough
CT: control target
= control target key end

     0   :  { %19 = vsyncpa [#allocation3], 0  ;;  %s7116_s0 = inlined_call_operand.vmem [shape: f32[32,2], index: 0, kind: input, shape index: {}]   ;;  %s7117_s1 = inlined_call_operand.vmem [shape: f32[2,32], index: 1, kind: input, shape index: {}]   ;;  %s7118_s2 = inlined_call_operand.vmem [shape: f32[1,32], index: 2, kind: input, shape index: {}]   ;;  %s7119_s3 = inlined_call_operand.vmem [shape: f32[2,32,96], index: 3, kind: input, shape index: {}]   ;;  %s7120_s4 = inlined_call_operand.vmem [shape: f32[2,32,32], index: 4, kind: input, shape index: {}]   ;;  %s7121_s5 = inlined_call_operand.vmem [shape: f32[2,1,32], index: 5, kind: input, shape index: {}]   ;;  %s7122_s6 = inlined_call_operand.vmem [shape: f32[2,1,32], index: 6, kind: input, shape index: {}]   ;;  %s7123_s7 = inlined_call_operand.hbm [shape: f32[2,1,32], index: 7, kind: input, shape index: {}]   ;;  %s7124_s8 = inlined_call_operand.vmem [shape: f32[2,32,64], index: 8, kind: input, shape index: {}]   ;;  %s7125_s9 = inlined_call_operand.hbm [shape: f32[2,1,64], index: 9, kind: input, shape index: {}]   ;;  %s7126_s10 = inlined_call_operand.vmem [shape: f32[2,64,32], index: 10, kind: input, shape index: {}]   ;;  %s7127_s11 = inlined_call_operand.vmem [shape: f32[2,1,32], index: 11, kind: input, shape index: {}]   ;;  %s7128_s12 = inlined_call_operand.vmem [shape: f32[2,1,32], index: 12, kind: input, shape index: {}]   ;;  %s7129_s13 = inlined_call_operand.vmem [shape: f32[2,1,32], index: 13, kind: input, shape index: {}]   ;;  %s7130_s14 = inlined_call_operand.hbm [shape: f32[32,32], index: 14, kind: output, shape index: {}]  }
   0x1   :  { %20 = vsyncpa [#allocation6], 0 }
   0x2   :  { %21 = vsyncpa [#allocation4], 0  ;;  %s6025_s29 = smov [#allocation2]   ;;  %s5953_s17 = scalar_lea.hbm %s7123_s7, 32 }
   0x3   :  { %s41_s30 = sshll.u32 %s6025_s29, 4  ;;  %p5954_p0 = scmp.ne.s32.totalorder %s7123_s7, %s5953_s17  ;;  %s42_s30 = int_to_ptr.vmem [resolvable:$true] %s41_s30 }
   0x4   :  { %p5957_p1 = scmp.lt.u32.totalorder %s5953_s17, %s7123_s7 }
   0x6   :  { %p5959_p2 = pnand %p5957_p1, %p5954_p0 }
   0x8   :  { %5962 = shalt.err (!%p5959_p2)
}
   0x9   :  { %s5963_s22 = scalar_lea.vmem %s42_s30, 32  ;;  %p5968_p4 = scmp.lt.s32.totalorder %s42_s30, %s42_s30 }
   0xa   :  { %p5964_p3 = scmp.ne.s32.totalorder %s42_s30, %s5963_s22  ;;  %p5969_p5 = scmp.lt.s32.totalorder %s5963_s22, %s5963_s22 }
   0xc   :  { %p5970_p6 = por %p5969_p5, %p5968_p4 }
   0xe   :  { %p5971_p7 = pnand %p5970_p6, %p5964_p3 }
  0x10   :  { %5974 = shalt.err (!%p5971_p7)
}
  0x11   :  { %s6026_s23 = smov 16   ;;  %s6027_s24 = smov 1  }
  0x12   :  { %47 = dma.hbm_to_vmem [thread:$0]  %s7123_s7, 32, %s42_s30, [#allocation3], %s6026_s23, %s6026_s23, %s6027_s24  }
  0x13   :  { %s6028_s27 = smov [#allocation5]   ;;  %s5975_s16 = scalar_lea.hbm %s7125_s9, 32 }
  0x14   :  { %s55_s28 = sshll.u32 %s6028_s27, 4  ;;  %p5976_p8 = scmp.ne.s32.totalorder %s7125_s9, %s5975_s16  ;;  %s56_s28 = int_to_ptr.vmem [resolvable:$true] %s55_s28 }
  0x15   :  { %p5979_p9 = scmp.lt.u32.totalorder %s5975_s16, %s7125_s9 }
  0x17   :  { %p5981_p10 = pnand %p5979_p9, %p5976_p8 }
  0x19   :  { %5984 = shalt.err (!%p5981_p10)
}
  0x1a   :  { %s5985_s21 = scalar_lea.vmem %s56_s28, 32  ;;  %p5990_p12 = scmp.lt.s32.totalorder %s56_s28, %s56_s28 }
  0x1b   :  { %p5986_p11 = scmp.ne.s32.totalorder %s56_s28, %s5985_s21  ;;  %p5991_p13 = scmp.lt.s32.totalorder %s5985_s21, %s5985_s21 }
  0x1d   :  { %p5992_p0 = por %p5991_p13, %p5990_p12 }
  0x1f   :  { %p5993_p1 = pnand %p5992_p0, %p5986_p11 }
  0x21   :  { %5996 = shalt.err (!%p5993_p1)
}
  0x22   :  { %61 = dma.hbm_to_vmem [thread:$0]  %s7125_s9, 32, %s56_s28, [#allocation6], %s6026_s23, %s6026_s23, %s6027_s24  }
  0x23   :  { %6019 = dma.done.wait [#allocation3], 32  }
  0x24   :  { %6020 = vsyncadd [#allocation3], 4294967264 }
  0x25   :  { %6021 = dma.done.wait [#allocation6], 32  }
  0x26   :  { %6022 = vsyncadd [#allocation6], 4294967264  ;;  %v6029_v0 = vmov 0   ;;  %v77_v1 = vld [vmem:[%s7116_s0 + $0x8] sm:$0xff]  ;;  %v76_v2 = vld [vmem:[%s7116_s0] sm:$0xff]  ;;  %v6030_v6 = vmov 1   ;;  %v101_v12 = vlaneseq }
  0x27   :  { %5654 = vset.pattern.permute.xlu1 %v6029_v0  ;;  %5652 = vset.pattern.permute.xlu0 %v6029_v0  ;;  %v148_v3 = vld [vmem:[%s7119_s3] sm:$0xff]  ;;  %v149_v4 = vld [vmem:[%s7119_s3 + $0x8] sm:$0xff]  ;;  %v150_v7 = vld [vmem:[%s7119_s3 + $0x10] sm:$0xff]  ;;  %vm152_vm0 = vcmask 261120   ;;  %vm282_vm1 = vcmask 64512   ;;  %s6033_s26 = smov 104  }
  0x28   :  { %88 = vperm.xlu1 %5654, %v77_v1   ;;  %83 = vperm.xlu0 %5652, %v76_v2   ;;  %v5397_v5 = vpack.c.bf16 %v149_v4, %v148_v3  ;;  %v151_v8 = vld [vmem:[%s7119_s3 + $0x18] sm:$0xff]  ;;  %v78_v9 = vld [vmem:[%s7116_s0 + $0x10] sm:$0xff]  ;;  %v102_v13 = vshrl.u32 %v101_v12, 7  ;;  %v80_v16 = vld [vmem:[%s7117_s1] sm:$0x3]  ;;  %s6031_s1 = smov 120  }
  0x29   :  { %v5401_v10 = vpack.c.bf16 %v151_v8, %v150_v7  ;;  %v79_v11 = vld [vmem:[%s7116_s0 + $0x18] sm:$0xff]  ;;  %v4677_v27 = vld [vmem:[%s7118_s2] ss:$0 sm:$0xff]  ;;  %s6032_s2 = smov 112   ;;  %s6034_s27 = smov 96   ;;  %vm6256_vm2 = vmpackc.low %vm282_vm1, %vm282_vm1  ;;  %vm991_vm3 = vcmask 130048  }
  0x2a   :  { %5398 = vmatprep.subr.bf16.mxu1 %v5397_v5  ;;  %v103_v14 = vsub.s32 0, %v102_v13  ;;  %v127_v15 = vsub.s32 1, %v102_v13  ;;  %s6035_s29 = smov 64   ;;  %s6036_s15 = smov 8   ;;  %vm1920_vm4 = vcmask 195584   ;;  %vm2231_vm5 = vcmask 523264  }
  0x2b   :  { %5400 = vmatpush3.bf16.msra.mxu1 %v5397_v5  ;;  %s6037_s21 = smov 24   ;;  %s6038_s17 = smov [#allocation7]  }
  0x2c   :  { %5655 = vset.pattern.permute.xlu1 %v6030_v6  ;;  %5653 = vset.pattern.permute.xlu0 %v6030_v6  ;;  %v104_v19 = vrot.slane %v80_v16, %v103_v14  ;;  %v128_v20 = vrot.slane %v80_v16, %v127_v15  ;;  %s4664_s18 = sshll.u32 %s6038_s17, 4  ;;  %s4665_s18 = int_to_ptr.vmem [resolvable:$true] %s4664_s18 }
  0x2d   :  { %114 = vperm.xlu1 %5655, %v77_v1   ;;  %110 = vperm.xlu0 %5653, %v76_v2   ;;  %p6002_p3 = scmp.lt.s32.totalorder %s4665_s18, %s4665_s18 }
  0x2e   :  { %5402 = vmatprep.subr.bf16.mxu1 %v5401_v10 }
  0x2f   :  { %5404 = vmatpush3.bf16.msra.mxu1 %v5401_v10 }
  0x31   :  { %5656 = vset.pattern.permute.xlu1 %v6029_v0  ;;  %118 = vperm.xlu0 %5653, %v78_v9  }
  0x32   :  { %93 = vperm.xlu1 %5656, %v78_v9  }
  0x35   :  { %122 = vperm.xlu0 %5653, %v79_v11  }
  0x36   :  { %98 = vperm.xlu1 %5656, %v79_v11  }
  0xa7   :  { %v89_v17 = vpop.permute.xlu1 %88  ;;  %v84_v18 = vpop.permute.xlu0 %83 }
  0xa8   :  { %v106_v23 = vmul.f32 %v104_v19, %v89_v17  ;;  %v105_v24 = vmul.f32 %v104_v19, %v84_v18 }
  0xac   :  { %v115_v21 = vpop.permute.xlu1 %114  ;;  %v111_v22 = vpop.permute.xlu0 %110 }
  0xad   :  { %v130_v25 = vmul.f32 %v128_v20, %v115_v21  ;;  %v129_v26 = vmul.f32 %v128_v20, %v111_v22 }
  0xaf   :  { %v134_v28 = vadd.f32 %v130_v25, %v106_v23  ;;  %v133_v29 = vadd.f32 %v129_v26, %v105_v24 }
  0xb0   :  { %v119_v30 = vpop.permute.xlu0 %118 }
  0xb1   :  { %v131_v31 = vmul.f32 %v128_v20, %v119_v30  ;;  %v94_v32 = vpop.permute.xlu1 %93  ;;  %v6173_v33 = vadd.f32 %v4677_v27, %v133_v29  ;;  %v6175_v34 = vadd.f32 %v4677_v27, %v134_v28 }
  0xb2   :  { %v107_v35 = vmul.f32 %v104_v19, %v94_v32 }
  0xb3   :  { %5053 = vmatprep.mubr.msk.f32.mxu1 %vm152_vm0, %v6173_v33 }
  0xb4   :  { %v135_v36 = vadd.f32 %v131_v31, %v107_v35  ;;  %5054 = vmatmul.mubr.msk.f32.vlgmr.msra.gmra.mrb[0].mxu1 %vm152_vm0, %v6175_v34  ;;  %v123_v37 = vpop.permute.xlu0 %122 }
  0xb5   :  { %v132_v38 = vmul.f32 %v128_v20, %v123_v37  ;;  %v99_v39 = vpop.permute.xlu1 %98 }
  0xb6   :  { %v108_v40 = vmul.f32 %v104_v19, %v99_v39  ;;  %v6181_v41 = vadd.f32 %v4677_v27, %v135_v36 }
  0xb8   :  { %v136_v42 = vadd.f32 %v132_v38, %v108_v40  ;;  %5056 = vmatprep.mubr.msk.f32.mxu1 %vm152_vm0, %v6181_v41 }
  0xba   :  { %v6185_v43 = vadd.f32 %v4677_v27, %v136_v42 }
  0xbc   :  { %5057 = vmatmul.mubr.msk.f32.gmra.mrb[2].mxu1 %vm152_vm0, %v6185_v43 }
 0x187   :  { %v6189_v44 = vpop.f32.mrb[0].mxu1 }
 0x188   :  { %256 = vrot.lane.b32.xlu0 %v6189_v44, %s6031_s1  ;;  %v231_v45 = vpop.f32.mrb[1].mxu1 }
 0x189   :  { %254 = vrot.lane.b32.xlu1 %v231_v45, %s6031_s1  ;;  %5063 = vmatprep.mubr.msk.f32.mxu1 %vm282_vm1, %v231_v45  ;;  %v5657_v46 = vpack.i.bf16 %v6189_v44, %v231_v45 }
 0x18f   :  { %v5058_v47 = vpop.f32.mrb[2].mxu1 }
 0x190   :  { %260 = vrot.lane.b32.xlu0 %v5058_v47, %s6031_s1  ;;  %v241_v48 = vpop.f32.mrb[3].mxu1 }
 0x191   :  { %258 = vrot.lane.b32.xlu1 %v241_v48, %s6031_s1  ;;  %5070 = vmatprep.mubr.msk.f32.mxu0 %vm282_vm1, %v241_v48  ;;  %v5662_v49 = vpack.i.bf16 %v5058_v47, %v241_v48 }
 0x194   :  { %264 = vrot.lane.b32.xlu0 %v6189_v44, %s6032_s2 }
 0x195   :  { %262 = vrot.lane.b32.xlu1 %v231_v45, %s6032_s2 }
 0x198   :  { %268 = vrot.lane.b32.xlu0 %v5058_v47, %s6032_s2 }
 0x199   :  { %266 = vrot.lane.b32.xlu1 %v241_v48, %s6032_s2 }
 0x19c   :  { %272 = vrot.lane.b32.xlu0 %v6189_v44, %s6033_s26 }
 0x19d   :  { %270 = vrot.lane.b32.xlu1 %v231_v45, %s6033_s26 }
 0x1a0   :  { %276 = vrot.lane.b32.xlu0 %v5058_v47, %s6033_s26 }
 0x1a1   :  { %274 = vrot.lane.b32.xlu1 %v241_v48, %s6033_s26 }
 0x1a4   :  { %5663 = vrot.lane.b32.xlu0 %v5662_v49, %s6034_s27 }
 0x1a5   :  { %5658 = vrot.lane.b32.xlu1 %v5657_v46, %s6034_s27 }
 0x1fa   :  { %v257_v50 = vpop.permute.xlu0 %256 }
 0x1fb   :  { %v255_v51 = vpop.permute.xlu1 %254 }
 0x1fc   :  { %v5667_v52 = vpack.i.bf16 %v257_v50, %v255_v51 }
 0x1fe   :  { %5668 = vrot.lane.b32.xlu1 %v5667_v52, %s6034_s27 }
 0x202   :  { %v6212_v53 = vpop.permute.xlu0 %260 }
 0x203   :  { %v259_v54 = vpop.permute.xlu1 %258 }
 0x204   :  { %v5672_v55 = vpack.i.bf16 %v6212_v53, %v259_v54 }
 0x206   :  { %5673 = vrot.lane.b32.xlu0 %v5672_v55, %s6034_s27  ;;  %v6216_v56 = vpop.permute.xlu0 %264 }
 0x207   :  { %v263_v57 = vpop.permute.xlu1 %262 }
 0x208   :  { %v6219_v58 = vpack.i.bf16 %v6216_v56, %v263_v57 }
 0x20a   :  { %5678 = vrot.lane.b32.xlu1 %v6219_v58, %s6034_s27  ;;  %v6223_v59 = vpop.permute.xlu0 %268 }
 0x20b   :  { %v6225_v60 = vpop.permute.xlu1 %266 }
 0x20c   :  { %v6229_v61 = vpack.i.bf16 %v6223_v59, %v6225_v60 }
 0x20e   :  { %5683 = vrot.lane.b32.xlu0 %v6229_v61, %s6034_s27  ;;  %v6233_v62 = vpop.permute.xlu0 %272 }
 0x20f   :  { %v6235_v63 = vpop.permute.xlu1 %270 }
 0x210   :  { %v6239_v0 = vpack.i.bf16 %v6233_v62, %v6235_v63 }
 0x212   :  { %5688 = vrot.lane.b32.xlu1 %v6239_v0, %s6034_s27  ;;  %v6243_v1 = vpop.permute.xlu0 %276 }
 0x213   :  { %v6245_v2 = vpop.permute.xlu1 %274 }
 0x214   :  { %v6249_v3 = vpack.i.bf16 %v6243_v1, %v6245_v2 }
 0x216   :  { %5703 = vrot.lane.b32.xlu1 %v5662_v49, %s6035_s29  ;;  %5693 = vrot.lane.b32.xlu0 %v6249_v3, %s6034_s27  ;;  %v5664_v4 = vpop.permute.xlu0 %5663 }
 0x217   :  { %v5659_v5 = vpop.permute.xlu1 %5658  ;;  %v5666_v6 = vunpack.i.h.bf16 %v5664_v4  ;;  %v5665_v7 = vunpack.i.l.bf16 %v5664_v4 }
 0x218   :  { %v5661_v8 = vunpack.i.h.bf16 %v5659_v5  ;;  %v5660_v9 = vunpack.i.l.bf16 %v5659_v5 }
 0x219   :  { %v5411_v11 = vpack.c.bf16 %v5666_v6, %v5665_v7 }
 0x21a   :  { %v5405_v12 = vpack.c.bf16 %v5661_v8, %v5660_v9  ;;  %5708 = vrot.lane.b32.xlu1 %v5667_v52, %s6035_s29  ;;  %5698 = vrot.lane.b32.xlu0 %v5657_v46, %s6035_s29 }
 0x21b   :  { %5413 = vmatprep.subr.msk.bf16.mxu0 %vm6256_vm2, %v5411_v11 }
 0x21c   :  { %5407 = vmatprep.subr.msk.bf16.mxu1 %vm6256_vm2, %v5405_v12  ;;  %5416 = vmatpush3.bf16.xpose.msk.msra.mxu0 %vm6256_vm2, %v5411_v11 }
 0x21d   :  { %5410 = vmatpush3.bf16.xpose.msk.msra.mxu1 %vm6256_vm2, %v5405_v12 }
 0x21e   :  { %5713 = vrot.lane.b32.xlu0 %v5672_v55, %s6035_s29 }
 0x223   :  { %5071 = vmatmul.mubr.msk.f32.vlgmr.msra.gmra.mrb[0].mxu0 %vm282_vm1, %v5058_v47 }
 0x224   :  { %5064 = vmatmul.mubr.msk.f32.vlgmr.msra.gmra.mrb[4].mxu1 %vm282_vm1, %v6189_v44  ;;  %5084 = vmatprep.mubr.msk.f32.mxu0 %vm282_vm1, %v259_v54 }
 0x225   :  { %5077 = vmatprep.mubr.msk.f32.mxu1 %vm282_vm1, %v255_v51 }
 0x270   :  { %v5669_v13 = vpop.permute.xlu1 %5668 }
 0x271   :  { %v5671_v14 = vunpack.i.h.bf16 %v5669_v13  ;;  %v5670_v15 = vunpack.i.l.bf16 %v5669_v13 }
 0x273   :  { %v5417_v16 = vpack.c.bf16 %v5671_v14, %v5670_v15 }
 0x275   :  { %5419 = vmatprep.subr.msk.bf16.mxu1 %vm6256_vm2, %v5417_v16 }
 0x276   :  { %5422 = vmatpush3.bf16.xpose.msk.msra.mxu1 %vm6256_vm2, %v5417_v16 }
 0x278   :  { %v5674_v17 = vpop.permute.xlu0 %5673 }
 0x279   :  { %v5676_v18 = vunpack.i.h.bf16 %v5674_v17  ;;  %v5675_v19 = vunpack.i.l.bf16 %v5674_v17 }
 0x27b   :  { %v5423_v20 = vpack.c.bf16 %v5676_v18, %v5675_v19 }
 0x27c   :  { %v5679_v21 = vpop.permute.xlu1 %5678 }
 0x27d   :  { %v5681_v22 = vunpack.i.h.bf16 %v5679_v21  ;;  %v5680_v23 = vunpack.i.l.bf16 %v5679_v21  ;;  %5078 = vmatmul.mubr.msk.f32.vlgmr.msra.gmra.mrb[6].mxu1 %vm282_vm1, %v257_v50  ;;  %5425 = vmatprep.subr.msk.bf16.mxu0 %vm6256_vm2, %v5423_v20 }
 0x27e   :  { %5428 = vmatpush3.bf16.xpose.msk.msra.mxu0 %vm6256_vm2, %v5423_v20  ;;  %5091 = vmatprep.mubr.msk.f32.mxu1 %vm282_vm1, %v263_v57 }
 0x27f   :  { %v5429_v24 = vpack.c.bf16 %v5681_v22, %v5680_v23 }
 0x280   :  { %v5684_v25 = vpop.permute.xlu0 %5683 }
 0x281   :  { %v5686_v26 = vunpack.i.h.bf16 %v5684_v25  ;;  %v5685_v27 = vunpack.i.l.bf16 %v5684_v25  ;;  %5431 = vmatprep.subr.msk.bf16.mxu1 %vm6256_vm2, %v5429_v24 }
 0x282   :  { %5434 = vmatpush3.bf16.xpose.msk.msra.mxu1 %vm6256_vm2, %v5429_v24 }
 0x283   :  { %v5435_v28 = vpack.c.bf16 %v5686_v26, %v5685_v27 }
 0x284   :  { %v5689_v29 = vpop.permute.xlu1 %5688 }
 0x285   :  { %v5691_v30 = vunpack.i.h.bf16 %v5689_v29  ;;  %v5690_v31 = vunpack.i.l.bf16 %v5689_v29  ;;  %5085 = vmatmul.mubr.msk.f32.vlgmr.msra.gmra.mrb[2].mxu0 %vm282_vm1, %v6212_v53  ;;  %5437 = vmatprep.subr.msk.bf16.mxu0 %vm6256_vm2, %v5435_v28 }
 0x286   :  { %5440 = vmatpush3.bf16.xpose.msk.msra.mxu0 %vm6256_vm2, %v5435_v28  ;;  %5098 = vmatprep.mubr.msk.f32.mxu0 %vm282_vm1, %v6225_v60 }
 0x287   :  { %v5441_v32 = vpack.c.bf16 %v5691_v30, %v5690_v31 }
 0x288   :  { %v5704_v35 = vpop.permute.xlu1 %5703  ;;  %v5694_v36 = vpop.permute.xlu0 %5693 }
 0x289   :  { %v5696_v37 = vunpack.i.h.bf16 %v5694_v36  ;;  %v5695_v38 = vunpack.i.l.bf16 %v5694_v36  ;;  %5092 = vmatmul.mubr.msk.f32.vlgmr.msra.gmra.mrb[8].mxu1 %vm282_vm1, %v6216_v56  ;;  %5443 = vmatprep.subr.msk.bf16.mxu1 %vm6256_vm2, %v5441_v32  ;;  %v5706_v40 = vunpack.i.h.bf16 %v5704_v35  ;;  %v5705_v42 = vunpack.i.l.bf16 %v5704_v35 }
 0x28a   :  { %5446 = vmatpush3.bf16.xpose.msk.msra.mxu1 %vm6256_vm2, %v5441_v32  ;;  %5105 = vmatprep.mubr.msk.f32.mxu1 %vm282_vm1, %v6235_v63 }
 0x28b   :  { %v5447_v39 = vpack.c.bf16 %v5696_v37, %v5695_v38  ;;  %v6316_v52 = vpack.c.bf16 %v5706_v40, %v5705_v42 }
 0x28c   :  { %v5709_v44 = vpop.permute.xlu1 %5708  ;;  %v5699_v45 = vpop.permute.xlu0 %5698 }
 0x28d   :  { %v5711_v46 = vunpack.i.h.bf16 %v5709_v44  ;;  %v5710_v47 = vunpack.i.l.bf16 %v5709_v44  ;;  %v5701_v48 = vunpack.i.h.bf16 %v5699_v45  ;;  %v5700_v49 = vunpack.i.l.bf16 %v5699_v45  ;;  %5099 = vmatmul.mubr.msk.f32.vlgmr.msra.gmra.mrb[4].mxu0 %vm282_vm1, %v6223_v59  ;;  %5449 = vmatprep.subr.msk.bf16.mxu0 %vm6256_vm2, %v5447_v39 }
 0x28e   :  { %5452 = vmatpush3.bf16.xpose.msk.msra.mxu0 %vm6256_vm2, %v5447_v39  ;;  %5112 = vmatprep.mubr.msk.f32.mxu0 %vm282_vm1, %v6245_v2 }
 0x28f   :  { %v5453_v50 = vpack.c.bf16 %v5701_v48, %v5700_v49  ;;  %v5461_v51 = vpack.c.bf16 %v5711_v46, %v5710_v47 }
 0x290   :  { %v6389_v46 = vpop.permute.xlu0 %5713 }
 0x291   :  { %5106 = vmatmul.mubr.msk.f32.vlgmr.msra.gmra.mrb[10].mxu1 %vm282_vm1, %v6233_v62  ;;  %5454 = vmatprep.subr.bf16.mxu1 %v5453_v50 }
 0x292   :  { %5462 = vmatprep.subr.bf16.mxu0 %v5461_v51  ;;  %5456 = vmatpush3.bf16.msra.mxu1 %v5453_v50 }
 0x293   :  { %5458 = vmatprep.subr.bf16.mxu1 %v6316_v52 }
 0x295   :  { %5113 = vmatmul.mubr.msk.f32.vlgmr.msra.gmra.mrb[6].mxu0 %vm282_vm1, %v6243_v1 }
 0x296   :  { %5464 = vmatpush3.bf16.msra.mxu0 %v5461_v51 }
 0x2f6   :  { %v5072_v53 = vpop.f32.mrb[0].mxu0 }
 0x2f7   :  { %v5065_v54 = vpop.f32.mrb[4].mxu1  ;;  %v444_v55 = vpop.f32.mrb[1].mxu0  ;;  %v6325_v60 = vmul.f32 0.35355338, %v5072_v53 }
 0x2f8   :  { %v6321_v56 = vmul.f32 0.35355338, %v5065_v54  ;;  %v357_v57 = vpop.f32.mrb[5].mxu1  ;;  %v6331_v1 = vmul.f32 0.35355338, %v444_v55 }
 0x2f9   :  { %v6323_v59 = vmul.f32 0.35355338, %v357_v57  ;;  %v1001_v2 = vsel %vm991_vm3, %v6325_v60, -inf }
 0x2fa   :  { %v995_v62 = vsel %vm991_vm3, %v6321_v56, -inf  ;;  %v998_v4 = vsel %vm991_vm3, %v6331_v1, -inf }
 0x2fb   :  { %996 = vmax.xlane.f32.xlu0 %v995_v62  ;;  %v992_v63 = vsel %vm991_vm3, %v6323_v59, -inf }
 0x2fc   :  { %993 = vmax.xlane.f32.xlu1 %v992_v63 }
 0x2ff   :  { %1002 = vmax.xlane.f32.xlu0 %v1001_v2 }
 0x303   :  { %999 = vmax.xlane.f32.xlu0 %v998_v4 }
 0x350   :  { %v5079_v5 = vpop.f32.mrb[6].mxu1 }
 0x351   :  { %v6337_v6 = vmul.f32 0.35355338, %v5079_v5  ;;  %v531_v7 = vpop.f32.mrb[7].mxu1 }
 0x352   :  { %v6339_v8 = vmul.f32 0.35355338, %v531_v7 }
 0x353   :  { %v1007_v9 = vsel %vm991_vm3, %v6337_v6, -inf }
 0x354   :  { %1008 = vmax.xlane.f32.xlu1 %v1007_v9  ;;  %v1004_v11 = vsel %vm991_vm3, %v6339_v8, -inf }
 0x358   :  { %1005 = vmax.xlane.f32.xlu1 %v1004_v11  ;;  %v5086_v12 = vpop.f32.mrb[2].mxu0 }
 0x359   :  { %v6345_v13 = vmul.f32 0.35355338, %v5086_v12  ;;  %v618_v14 = vpop.f32.mrb[3].mxu0 }
 0x35a   :  { %v6347_v15 = vmul.f32 0.35355338, %v618_v14 }
 0x35b   :  { %v1013_v16 = vsel %vm991_vm3, %v6345_v13, -inf }
 0x35c   :  { %v5093_v17 = vpop.f32.mrb[8].mxu1  ;;  %1014 = vmax.xlane.f32.xlu0 %v1013_v16  ;;  %v1010_v22 = vsel %vm991_vm3, %v6347_v15, -inf }
 0x35d   :  { %v6351_v18 = vmul.f32 0.35355338, %v5093_v17  ;;  %v705_v19 = vpop.f32.mrb[9].mxu1 }
 0x35e   :  { %v6353_v20 = vmul.f32 0.35355338, %v705_v19 }
 0x35f   :  { %v1019_v21 = vsel %vm991_vm3, %v6351_v18, -inf }
 0x360   :  { %1020 = vmax.xlane.f32.xlu1 %v1019_v21  ;;  %1011 = vmax.xlane.f32.xlu0 %v1010_v22  ;;  %v5100_v23 = vpop.f32.mrb[4].mxu0  ;;  %v1016_v27 = vsel %vm991_vm3, %v6353_v20, -inf }
 0x361   :  { %v6359_v24 = vmul.f32 0.35355338, %v5100_v23  ;;  %v792_v25 = vpop.f32.mrb[5].mxu0 }
 0x362   :  { %v6361_v26 = vmul.f32 0.35355338, %v792_v25 }
 0x363   :  { %v1025_v28 = vsel %vm991_vm3, %v6359_v24, -inf }
 0x364   :  { %1017 = vmax.xlane.f32.xlu1 %v1016_v27  ;;  %v5107_v29 = vpop.f32.mrb[10].mxu1  ;;  %1026 = vmax.xlane.f32.xlu0 %v1025_v28  ;;  %v1022_v36 = vsel %vm991_vm3, %v6361_v26, -inf }
 0x365   :  { %v6367_v30 = vmul.f32 0.35355338, %v5107_v29  ;;  %v879_v31 = vpop.f32.mrb[11].mxu1 }
 0x366   :  { %v6369_v32 = vmul.f32 0.35355338, %v879_v31 }
 0x367   :  { %v1031_v35 = vsel %vm991_vm3, %v6367_v30, -inf }
 0x368   :  { %1032 = vmax.xlane.f32.xlu1 %v1031_v35  ;;  %1023 = vmax.xlane.f32.xlu0 %v1022_v36  ;;  %v5114_v37 = vpop.f32.mrb[6].mxu0  ;;  %v1028_v42 = vsel %vm991_vm3, %v6369_v32, -inf }
 0x369   :  { %v966_v38 = vpop.f32.mrb[7].mxu0  ;;  %v6377_v40 = vmul.f32 0.35355338, %v5114_v37 }
 0x36a   :  { %v6375_v39 = vmul.f32 0.35355338, %v966_v38 }
 0x36b   :  { %v1037_v45 = vsel %vm991_vm3, %v6377_v40, -inf }
 0x36c   :  { %1029 = vmax.xlane.f32.xlu1 %v1028_v42  ;;  %v1034_v44 = vsel %vm991_vm3, %v6375_v39, -inf }
 0x36d   :  { %1035 = vmax.xlane.f32.xlu0 %v1034_v44 }
 0x370   :  { %1038 = vmax.xlane.f32.xlu1 %v1037_v45 }
 0x381   :  { %5718 = vrot.lane.b32.xlu1 %v6219_v58, %s6035_s29 }
 0x383   :  { %5723 = vrot.lane.b32.xlu0 %v6229_v61, %s6035_s29 }
 0x388   :  { %v997_v47 = vpop.xlane.xlu0 %996 }
 0x389   :  { %v994_v48 = vpop.xlane.xlu1 %993  ;;  %v1041_v51 = vsub.f32 %v6321_v56, %v997_v47 }
 0x38a   :  { %v1040_v49 = vsub.f32 %v6323_v59, %v994_v48 }
 0x38b   :  { %v1058_v57 = vmul.f32 1.442695, %v1041_v51 }
 0x38c   :  { %v1003_v50 = vpop.xlane.xlu0 %1002  ;;  %v1056_v53 = vmul.f32 1.442695, %v1040_v49 }
 0x38d   :  { %v1043_v54 = vsub.f32 %v6325_v60, %v1003_v50 }
 0x38e   :  { %5817 = vpow2.f32 %v1056_v53 }
 0x38f   :  { %v1062_v62 = vmul.f32 1.442695, %v1043_v54  ;;  %5819 = vpow2.f32 %v1058_v57 }
 0x390   :  { %v1000_v55 = vpop.xlane.xlu0 %999 }
 0x391   :  { %v1042_v58 = vsub.f32 %v6331_v1, %v1000_v55  ;;  %5821 = vpow2.f32 %v1062_v62 }
 0x393   :  { %v1060_v61 = vmul.f32 1.442695, %v1042_v58 }
 0x395   :  { %5823 = vpow2.f32 %v1060_v61 }
 0x398   :  { %v6395_v63 = vpop.eup %5817 }
 0x399   :  { %v6397_v2 = vpop.eup %5819  ;;  %v1088_v56 = vsel %vm991_vm3, %v6395_v63, 0.0 }
 0x39a   :  { %v1091_v60 = vsel %vm991_vm3, %v6397_v2, 0.0 }
 0x39b   :  { %v6401_v59 = vpop.eup %5821 }
 0x39c   :  { %v1097_v1 = vsel %vm991_vm3, %v6401_v59, 0.0 }
 0x39f   :  { %v6407_v4 = vpop.eup %5823 }
 0x3a0   :  { %v1094_v5 = vsel %vm991_vm3, %v6407_v4, 0.0 }
 0x3a2   :  { %1089 = vadd.xlane.f32.xlu0 %v1088_v56 }
 0x3a5   :  { %1092 = vadd.xlane.f32.xlu1 %v1091_v60 }
 0x3a6   :  { %1098 = vadd.xlane.f32.xlu0 %v1097_v1 }
 0x3aa   :  { %1095 = vadd.xlane.f32.xlu0 %v1094_v5 }
 0x3e1   :  { %v1009_v7 = vpop.xlane.xlu1 %1008 }
 0x3e2   :  { %v1045_v9 = vsub.f32 %v6337_v6, %v1009_v7 }
 0x3e4   :  { %v1066_v11 = vmul.f32 1.442695, %v1045_v9 }
 0x3e5   :  { %v1006_v12 = vpop.xlane.xlu1 %1005 }
 0x3e6   :  { %5825 = vpow2.f32 %v1066_v11  ;;  %v1044_v14 = vsub.f32 %v6339_v8, %v1006_v12 }
 0x3e8   :  { %v1064_v16 = vmul.f32 1.442695, %v1044_v14 }
 0x3e9   :  { %v1015_v17 = vpop.xlane.xlu0 %1014 }
 0x3ea   :  { %5827 = vpow2.f32 %v1064_v16  ;;  %v1047_v19 = vsub.f32 %v6345_v13, %v1015_v17 }
 0x3ec   :  { %v1070_v21 = vmul.f32 1.442695, %v1047_v19 }
 0x3ed   :  { %v1021_v22 = vpop.xlane.xlu1 %1020  ;;  %v1012_v23 = vpop.xlane.xlu0 %1011 }
 0x3ee   :  { %5829 = vpow2.f32 %v1070_v21  ;;  %v1049_v25 = vsub.f32 %v6351_v18, %v1021_v22  ;;  %v1046_v27 = vsub.f32 %v6347_v15, %v1012_v23 }
 0x3f0   :  { %v6416_v28 = vpop.eup %5825  ;;  %v1074_v6 = vmul.f32 1.442695, %v1049_v25  ;;  %v1068_v29 = vmul.f32 1.442695, %v1046_v27 }
 0x3f1   :  { %v1018_v31 = vpop.xlane.xlu1 %1017  ;;  %v1027_v35 = vpop.xlane.xlu0 %1026  ;;  %v1103_v8 = vsel %vm991_vm3, %v6416_v28, 0.0 }
 0x3f2   :  { %5831 = vpow2.f32 %v1074_v6  ;;  %v1048_v13 = vsub.f32 %v6353_v20, %v1018_v31  ;;  %v1051_v36 = vsub.f32 %v6359_v24, %v1027_v35  ;;  %1104 = vadd.xlane.f32.xlu1 %v1103_v8 }
 0x3f3   :  { %5833 = vpow2.f32 %v1068_v29 }
 0x3f4   :  { %v6422_v37 = vpop.eup %5827  ;;  %v1072_v18 = vmul.f32 1.442695, %v1048_v13  ;;  %v1078_v15 = vmul.f32 1.442695, %v1051_v36 }
 0x3f5   :  { %v1033_v38 = vpop.xlane.xlu1 %1032  ;;  %v1024_v42 = vpop.xlane.xlu0 %1023  ;;  %v1100_v44 = vsel %vm991_vm3, %v6422_v37, 0.0 }
 0x3f6   :  { %5835 = vpow2.f32 %v1072_v18  ;;  %v1053_v45 = vsub.f32 %v6367_v30, %v1033_v38  ;;  %v1050_v47 = vsub.f32 %v6361_v26, %v1024_v42  ;;  %1101 = vadd.xlane.f32.xlu1 %v1100_v44  ;;  %v5716_v18 = vunpack.i.h.bf16 %v6389_v46 }
 0x3f7   :  { %5837 = vpow2.f32 %v1078_v15  ;;  %v5715_v15 = vunpack.i.l.bf16 %v6389_v46 }
 0x3f8   :  { %v6428_v20 = vpop.eup %5829  ;;  %v1082_v24 = vmul.f32 1.442695, %v1053_v45  ;;  %v1076_v48 = vmul.f32 1.442695, %v1050_v47 }
 0x3f9   :  { %v1030_v49 = vpop.xlane.xlu1 %1029  ;;  %v1109_v50 = vsel %vm991_vm3, %v6428_v20, 0.0  ;;  %v5465_v38 = vpack.c.bf16 %v5716_v18, %v5715_v15 }
 0x3fa   :  { %5839 = vpow2.f32 %v1082_v24  ;;  %v1052_v51 = vsub.f32 %v6369_v32, %v1030_v49  ;;  %1110 = vadd.xlane.f32.xlu0 %v1109_v50  ;;  %v1036_v53 = vpop.xlane.xlu0 %1035 }
 0x3fb   :  { %5841 = vpow2.f32 %v1076_v48  ;;  %v1054_v30 = vsub.f32 %v6375_v39, %v1036_v53 }
 0x3fc   :  { %v6434_v54 = vpop.eup %5831  ;;  %v1080_v26 = vmul.f32 1.442695, %v1052_v51 }
 0x3fd   :  { %v6436_v55 = vpop.eup %5833  ;;  %v1084_v57 = vmul.f32 1.442695, %v1054_v30  ;;  %v1039_v62 = vpop.xlane.xlu1 %1038  ;;  %v1115_v58 = vsel %vm991_vm3, %v6434_v54, 0.0 }
 0x3fe   :  { %5843 = vpow2.f32 %v1080_v26  ;;  %v1055_v61 = vsub.f32 %v6377_v40, %v1039_v62  ;;  %1116 = vadd.xlane.f32.xlu1 %v1115_v58  ;;  %v1106_v32 = vsel %vm991_vm3, %v6436_v55, 0.0  ;;  %v5724_v6 = vpop.permute.xlu0 %5723 }
 0x3ff   :  { %5845 = vpow2.f32 %v1084_v57  ;;  %1107 = vadd.xlane.f32.xlu0 %v1106_v32  ;;  %v5726_v45 = vunpack.i.h.bf16 %v5724_v6  ;;  %v5725_v47 = vunpack.i.l.bf16 %v5724_v6 }
 0x400   :  { %v6443_v39 = vpop.eup %5835  ;;  %v1086_v56 = vmul.f32 1.442695, %v1055_v61 }
 0x401   :  { %v6445_v60 = vpop.eup %5837  ;;  %v5719_v1 = vpop.permute.xlu1 %5718  ;;  %v1112_v5 = vsel %vm991_vm3, %v6443_v39, 0.0  ;;  %v5473_v46 = vpack.c.bf16 %v5726_v45, %v5725_v47  ;;  %v1928_v45 = vld [vmem:[%s7120_s4 + $0x18] sm:$0xff] }
 0x402   :  { %5847 = vpow2.f32 %v1086_v56  ;;  %v5721_v7 = vunpack.i.h.bf16 %v5719_v1  ;;  %v5720_v9 = vunpack.i.l.bf16 %v5719_v1  ;;  %1113 = vadd.xlane.f32.xlu1 %v1112_v5  ;;  %v1121_v40 = vsel %vm991_vm3, %v6445_v60, 0.0 }
 0x403   :  { %1122 = vadd.xlane.f32.xlu0 %v1121_v40 }
 0x404   :  { %v6451_v11 = vpop.eup %5839  ;;  %v6453_v12 = vpack.c.bf16 %v5721_v7, %v5720_v9 }
 0x405   :  { %v6455_v14 = vpop.eup %5841  ;;  %v1127_v16 = vsel %vm991_vm3, %v6451_v11, 0.0 }
 0x406   :  { %1128 = vadd.xlane.f32.xlu1 %v1127_v16  ;;  %5470 = vmatprep.subr.bf16.mxu0 %v6453_v12  ;;  %v1118_v17 = vsel %vm991_vm3, %v6455_v14, 0.0 }
 0x407   :  { %1119 = vadd.xlane.f32.xlu0 %v1118_v17 }
 0x408   :  { %v6462_v19 = vpop.eup %5843 }
 0x409   :  { %v6464_v21 = vpop.eup %5845  ;;  %v1124_v22 = vsel %vm991_vm3, %v6462_v19, 0.0 }
 0x40a   :  { %1125 = vadd.xlane.f32.xlu1 %v1124_v22  ;;  %v1130_v23 = vsel %vm991_vm3, %v6464_v21, 0.0 }
 0x40b   :  { %1131 = vadd.xlane.f32.xlu0 %v1130_v23 }
 0x40c   :  { %v6470_v25 = vpop.eup %5847 }
 0x40d   :  { %v1133_v27 = vsel %vm991_vm3, %v6470_v25, 0.0 }
 0x40e   :  { %1134 = vadd.xlane.f32.xlu1 %v1133_v27 }
 0x41f   :  { %5728 = vrot.lane.b32.xlu1 %v6239_v0, %s6035_s29 }
 0x421   :  { %5733 = vrot.lane.b32.xlu0 %v6249_v3, %s6035_s29 }
 0x42f   :  { %v1090_v29 = vpop.xlane.xlu0 %1089 }
 0x430   :  { %5849 = vrcp.f32 %v1090_v29 }
 0x432   :  { %v1093_v31 = vpop.xlane.xlu1 %1092 }
 0x433   :  { %5851 = vrcp.f32 %v1093_v31  ;;  %v1099_v35 = vpop.xlane.xlu0 %1098 }
 0x434   :  { %5853 = vrcp.f32 %v1099_v35 }
 0x437   :  { %v1096_v8 = vpop.xlane.xlu0 %1095 }
 0x438   :  { %5855 = vrcp.f32 %v1096_v8 }
 0x43a   :  { %v5850_v13 = vpop.eup %5849 }
 0x43b   :  { %v1137_v36 = vmul.f32 %v5850_v13, %v6395_v63 }
 0x43d   :  { %v5852_v0 = vpop.eup %5851  ;;  %5119 = vmatprep.mubr.msk.f32.mxu1 %vm991_vm3, %v1137_v36 }
 0x43e   :  { %v1139_v3 = vmul.f32 %v5852_v0, %v6397_v2  ;;  %v5854_v42 = vpop.eup %5853 }
 0x43f   :  { %v1143_v24 = vmul.f32 %v5854_v42, %v6401_v59 }
 0x440   :  { %5120 = vmatmul.mubr.msk.f32.vlgmr.msra.gmra.mrb[12].mxu1 %vm991_vm3, %v1139_v3 }
 0x441   :  { %5460 = vmatpush3.bf16.msra.mxu1 %v6316_v52 }
 0x442   :  { %v5856_v44 = vpop.eup %5855  ;;  %5466 = vmatprep.subr.bf16.mxu1 %v5465_v38 }
 0x443   :  { %v1141_v63 = vmul.f32 %v5856_v44, %v6407_v4  ;;  %v1927_v44 = vld [vmem:[%s7120_s4 + $0x10] sm:$0xff] }
 0x444   :  { %v5489_v47 = vpack.c.bf16 %v1928_v45, %v1927_v44 }
 0x445   :  { %5126 = vmatprep.mubr.msk.f32.mxu1 %vm991_vm3, %v1141_v63 }
 0x446   :  { %5127 = vmatmul.mubr.msk.f32.vlgmr.msra.gmra.mrb[14].mxu1 %vm991_vm3, %v1143_v24 }
 0x447   :  { %5468 = vmatpush3.bf16.msra.mxu1 %v5465_v38 }
 0x448   :  { %5474 = vmatprep.subr.bf16.mxu1 %v5473_v46 }
 0x47f   :  { %v1105_v2 = vpop.xlane.xlu1 %1104 }
 0x480   :  { %5857 = vrcp.f32 %v1105_v2 }
 0x483   :  { %v1102_v48 = vpop.xlane.xlu1 %1101 }
 0x484   :  { %5859 = vrcp.f32 %v1102_v48 }
 0x487   :  { %v1111_v52 = vpop.xlane.xlu0 %1110 }
 0x488   :  { %5861 = vrcp.f32 %v1111_v52 }
 0x48a   :  { %v5858_v51 = vpop.eup %5857 }
 0x48b   :  { %v1117_v49 = vpop.xlane.xlu1 %1116  ;;  %v1147_v26 = vmul.f32 %v5858_v51, %v6416_v28 }
 0x48c   :  { %v1108_v50 = vpop.xlane.xlu0 %1107 }
 0x48d   :  { %5863 = vrcp.f32 %v1108_v50 }
 0x48e   :  { %v5860_v4 = vpop.eup %5859  ;;  %5865 = vrcp.f32 %v1117_v49 }
 0x48f   :  { %v1114_v59 = vpop.xlane.xlu1 %1113  ;;  %v1145_v53 = vmul.f32 %v5860_v4, %v6422_v37 }
 0x490   :  { %5867 = vrcp.f32 %v1114_v59  ;;  %v1123_v30 = vpop.xlane.xlu0 %1122 }
 0x491   :  { %5133 = vmatprep.mubr.msk.f32.mxu0 %vm991_vm3, %v1145_v53  ;;  %5869 = vrcp.f32 %v1123_v30 }
 0x492   :  { %5134 = vmatmul.mubr.msk.f32.vlgmr.msra.gmra.mrb[8].mxu0 %vm991_vm3, %v1147_v26  ;;  %v5862_v58 = vpop.eup %5861 }
 0x493   :  { %5472 = vmatpush3.bf16.msra.mxu0 %v6453_v12  ;;  %v1129_v57 = vpop.xlane.xlu1 %1128  ;;  %v1151_v28 = vmul.f32 %v5862_v58, %v6428_v20 }
 0x494   :  { %v1120_v62 = vpop.xlane.xlu0 %1119 }
 0x495   :  { %5871 = vrcp.f32 %v1120_v62 }
 0x496   :  { %5873 = vrcp.f32 %v1129_v57 }
 0x497   :  { %v5864_v61 = vpop.eup %5863  ;;  %v1126_v32 = vpop.xlane.xlu1 %1125 }
 0x498   :  { %5875 = vrcp.f32 %v1126_v32  ;;  %v1132_v37 = vpop.xlane.xlu0 %1131  ;;  %v1149_v56 = vmul.f32 %v5864_v61, %v6436_v55  ;;  %v5866_v1 = vpop.eup %5865 }
 0x499   :  { %5877 = vrcp.f32 %v1132_v37  ;;  %v1155_v40 = vmul.f32 %v5866_v1, %v6434_v54 }
 0x49a   :  { %v5868_v5 = vpop.eup %5867  ;;  %5140 = vmatprep.mubr.msk.f32.mxu1 %vm991_vm3, %v1149_v56 }
 0x49b   :  { %5141 = vmatmul.mubr.msk.f32.vlgmr.msra.gmra.mrb[16].mxu1 %vm991_vm3, %v1151_v28  ;;  %v1135_v7 = vpop.xlane.xlu1 %1134  ;;  %v1153_v9 = vmul.f32 %v5868_v5, %v6443_v39  ;;  %v5870_v55 = vpop.eup %5869 }
 0x49c   :  { %5476 = vmatpush3.bf16.msra.mxu1 %v5473_v46  ;;  %5879 = vrcp.f32 %v1135_v7  ;;  %v5734_v12 = vpop.permute.xlu0 %5733  ;;  %v1159_v54 = vmul.f32 %v5870_v55, %v6445_v60 }
 0x49d   :  { %v5736_v16 = vunpack.i.h.bf16 %v5734_v12  ;;  %v5735_v17 = vunpack.i.l.bf16 %v5734_v12  ;;  %5147 = vmatprep.mubr.msk.f32.mxu0 %vm991_vm3, %v1153_v9 }
 0x49e   :  { %5148 = vmatmul.mubr.msk.f32.vlgmr.msra.gmra.mrb[10].mxu0 %vm991_vm3, %v1155_v40 }
 0x49f   :  { %v5872_v20 = vpop.eup %5871  ;;  %v5481_v22 = vpack.c.bf16 %v5736_v16, %v5735_v17  ;;  %v5729_v23 = vpop.permute.xlu1 %5728 }
 0x4a0   :  { %v5731_v27 = vunpack.i.h.bf16 %v5729_v23  ;;  %v5730_v6 = vunpack.i.l.bf16 %v5729_v23  ;;  %v1157_v29 = vmul.f32 %v5872_v20, %v6455_v14  ;;  %v5874_v39 = vpop.eup %5873 }
 0x4a1   :  { %5482 = vmatprep.subr.bf16.mxu1 %v5481_v22  ;;  %v1163_v60 = vmul.f32 %v5874_v39, %v6451_v11  ;;  %v1925_v11 = vld [vmem:[%s7120_s4] sm:$0xff]  ;;  %v2106_v39 = vld [vmem:[%s7124_s8 + $0x10] sm:$0xff] }
 0x4a2   :  { %v5876_v31 = vpop.eup %5875  ;;  %v5477_v35 = vpack.c.bf16 %v5731_v27, %v5730_v6  ;;  %5154 = vmatprep.mubr.msk.f32.mxu1 %vm991_vm3, %v1157_v29  ;;  %v2104_v27 = vld [vmem:[%s7124_s8] sm:$0xff]  ;;  %v2105_v6 = vld [vmem:[%s7124_s8 + $0x8] sm:$0xff] }
 0x4a3   :  { %v5878_v8 = vpop.eup %5877  ;;  %5155 = vmatmul.mubr.msk.f32.vlgmr.msra.gmra.mrb[18].mxu1 %vm991_vm3, %v1159_v54  ;;  %v1161_v13 = vmul.f32 %v5876_v31, %v6462_v19  ;;  %v5493_v29 = vpack.c.bf16 %v2105_v6, %v2104_v27  ;;  %v2107_v54 = vld [vmem:[%s7124_s8 + $0x18] sm:$0xff] }
 0x4a4   :  { %5484 = vmatpush3.bf16.msra.mxu1 %v5481_v22  ;;  %5478 = vmatprep.subr.bf16.mxu0 %v5477_v35  ;;  %v1165_v36 = vmul.f32 %v5878_v8, %v6464_v21  ;;  %v5497_v31 = vpack.c.bf16 %v2107_v54, %v2106_v39  ;;  %v2217_v8 = vld [vmem:[%s7126_s10 + $0x8] sm:$0xff] }
 0x4a5   :  { %5480 = vmatpush3.bf16.msra.mxu0 %v5477_v35  ;;  %5161 = vmatprep.mubr.msk.f32.mxu0 %vm991_vm3, %v1161_v13  ;;  %v2216_v35 = vld [vmem:[%s7126_s10] sm:$0xff]  ;;  %v2218_v13 = vld [vmem:[%s7126_s10 + $0x10] sm:$0xff] }
 0x4a6   :  { %v5880_v14 = vpop.eup %5879  ;;  %5168 = vmatprep.mubr.msk.f32.mxu1 %vm991_vm3, %v1165_v36  ;;  %5494 = vmatprep.subr.bf16.mxu1 %v5493_v29  ;;  %v5501_v36 = vpack.c.bf16 %v2217_v8, %v2216_v35 }
 0x4a7   :  { %v1167_v18 = vmul.f32 %v5880_v14, %v6470_v25  ;;  %v1926_v25 = vld [vmem:[%s7120_s4 + $0x8] sm:$0xff]  ;;  %v2219_v14 = vld [vmem:[%s7126_s10 + $0x18] sm:$0xff] }
 0x4a8   :  { %5162 = vmatmul.mubr.msk.f32.vlgmr.msra.gmra.mrb[12].mxu0 %vm991_vm3, %v1163_v60  ;;  %v5485_v42 = vpack.c.bf16 %v1926_v25, %v1925_v11  ;;  %v5505_v60 = vpack.c.bf16 %v2219_v14, %v2218_v13  ;;  %v4736_v14 = vld [vmem:[#allocation2] ss:$0 sm:$0xff] }
 0x4a9   :  { %5169 = vmatmul.mubr.msk.f32.vlgmr.msra.gmra.mrb[20].mxu1 %vm991_vm3, %v1167_v18  ;;  %v2220_v18 = vld [vmem:[%s7126_s10 + $0x20] sm:$0xff] }
 0x4aa   :  { %5486 = vmatprep.subr.bf16.mxu0 %v5485_v42  ;;  %5496 = vmatpush3.bf16.msra.mxu1 %v5493_v29 }
 0x4ab   :  { %5488 = vmatpush3.bf16.msra.mxu0 %v5485_v42  ;;  %5498 = vmatprep.subr.bf16.mxu1 %v5497_v31 }
 0x4ac   :  { %5490 = vmatprep.subr.bf16.mxu0 %v5489_v47 }
 0x4ae   :  { %5500 = vmatpush3.bf16.msra.mxu1 %v5497_v31  ;;  %v4735_v31 = vld [vmem:[%s7122_s6] ss:$0 sm:$0xff] }
 0x4af   :  { %5492 = vmatpush3.bf16.msra.mxu0 %v5489_v47 }
 0x4b0   :  { %5502 = vmatprep.subr.bf16.mxu0 %v5501_v36 }
 0x513   :  { %v5121_v15 = vpop.f32.mrb[12].mxu1 }
 0x514   :  { %v1246_v19 = vpop.f32.mrb[13].mxu1 }
 0x519   :  { %v5128_v0 = vpop.f32.mrb[14].mxu1 }
 0x51a   :  { %v1333_v3 = vpop.f32.mrb[15].mxu1 }
 0x565   :  { %v5135_v38 = vpop.f32.mrb[8].mxu0 }
 0x566   :  { %v1420_v21 = vpop.f32.mrb[9].mxu0  ;;  %1870 = vrot.lane.b32.xlu0 %v5135_v38, %s6036_s15 }
 0x567   :  { %1868 = vrot.lane.b32.xlu1 %v1420_v21, %s6036_s15 }
 0x56e   :  { %v5142_v63 = vpop.f32.mrb[16].mxu1 }
 0x56f   :  { %1874 = vrot.lane.b32.xlu0 %v5142_v63, %s6036_s15  ;;  %v1507_v24 = vpop.f32.mrb[17].mxu1 }
 0x570   :  { %1872 = vrot.lane.b32.xlu1 %v1507_v24, %s6036_s15 }
 0x571   :  { %v5149_v46 = vpop.f32.mrb[10].mxu0 }
 0x572   :  { %v1594_v2 = vpop.f32.mrb[11].mxu0 }
 0x573   :  { %1886 = vrot.lane.b32.xlu0 %v5149_v46, %s6026_s23 }
 0x574   :  { %1884 = vrot.lane.b32.xlu1 %v1594_v2, %s6026_s23 }
 0x576   :  { %v5156_v48 = vpop.f32.mrb[18].mxu1 }
 0x577   :  { %1890 = vrot.lane.b32.xlu0 %v5156_v48, %s6026_s23  ;;  %v1681_v52 = vpop.f32.mrb[19].mxu1 }
 0x578   :  { %1888 = vrot.lane.b32.xlu1 %v1681_v52, %s6026_s23 }
 0x57b   :  { %v5163_v49 = vpop.f32.mrb[12].mxu0 }
 0x57c   :  { %v1768_v50 = vpop.f32.mrb[13].mxu0  ;;  %1902 = vrot.lane.b32.xlu0 %v5163_v49, %s6037_s21  ;;  %v5170_v51 = vpop.f32.mrb[20].mxu1 }
 0x57d   :  { %1900 = vrot.lane.b32.xlu1 %v1768_v50, %s6037_s21  ;;  %v1855_v4 = vpop.f32.mrb[21].mxu1 }
 0x580   :  { %1906 = vrot.lane.b32.xlu0 %v5170_v51, %s6037_s21 }
 0x581   :  { %1904 = vrot.lane.b32.xlu1 %v1855_v4, %s6037_s21 }
 0x5d8   :  { %v1871_v59 = vpop.permute.xlu0 %1870 }
 0x5d9   :  { %v1869_v53 = vpop.permute.xlu1 %1868  ;;  %v1913_v56 = vsel %vm282_vm1, %v5121_v15, %v1871_v59  ;;  %v2221_v15 = vld [vmem:[%s7126_s10 + $0x28] sm:$0xff] }
 0x5da   :  { %v1912_v32 = vsel %vm282_vm1, %v1246_v19, %v1869_v53  ;;  %v5509_v19 = vpack.c.bf16 %v2221_v15, %v2220_v18 }
 0x5e1   :  { %v1875_v30 = vpop.permute.xlu0 %1874 }
 0x5e2   :  { %v1873_v26 = vpop.permute.xlu1 %1872  ;;  %v1915_v16 = vsel %vm282_vm1, %v5128_v0, %v1875_v30  ;;  %v4730_v0 = vld [vmem:[%s7121_s5] ss:$0 sm:$0xff] }
 0x5e3   :  { %v1914_v40 = vsel %vm282_vm1, %v1333_v3, %v1873_v26 }
 0x5e5   :  { %v1887_v57 = vpop.permute.xlu0 %1886 }
 0x5e6   :  { %v1885_v62 = vpop.permute.xlu1 %1884  ;;  %v1917_v5 = vsel %vm991_vm3, %v1913_v56, %v1887_v57 }
 0x5e7   :  { %v1916_v1 = vsel %vm991_vm3, %v1912_v32, %v1885_v62 }
 0x5e9   :  { %v1891_v58 = vpop.permute.xlu0 %1890 }
 0x5ea   :  { %v1889_v61 = vpop.permute.xlu1 %1888  ;;  %v1919_v20 = vsel %vm991_vm3, %v1915_v16, %v1891_v58 }
 0x5eb   :  { %v1918_v17 = vsel %vm991_vm3, %v1914_v40, %v1889_v61 }
 0x5ee   :  { %v1903_v37 = vpop.permute.xlu0 %1902 }
 0x5ef   :  { %v1901_v28 = vpop.permute.xlu1 %1900  ;;  %v1922_v9 = vsel %vm1920_vm4, %v1917_v5, %v1903_v37 }
 0x5f0   :  { %v1921_v7 = vsel %vm1920_vm4, %v1916_v1, %v1901_v28 }
 0x5f1   :  { %5179 = vmatprep.mubr.msk.f32.mxu0 %vm152_vm0, %v1921_v7 }
 0x5f2   :  { %5180 = vmatmul.mubr.msk.f32.vlgmr.msra.gmra.mrb[14].mxu0 %vm152_vm0, %v1922_v9  ;;  %v1907_v12 = vpop.permute.xlu0 %1906 }
 0x5f3   :  { %v1905_v55 = vpop.permute.xlu1 %1904  ;;  %v1924_v23 = vsel %vm1920_vm4, %v1919_v20, %v1907_v12  ;;  %5504 = vmatpush3.bf16.msra.mxu0 %v5501_v36 }
 0x5f4   :  { %v1923_v22 = vsel %vm1920_vm4, %v1918_v17, %v1905_v55  ;;  %5506 = vmatprep.subr.bf16.mxu0 %v5505_v60 }
 0x5f5   :  { %5182 = vmatprep.mubr.msk.f32.mxu0 %vm152_vm0, %v1923_v22 }
 0x5f6   :  { %5183 = vmatmul.mubr.msk.f32.gmra.mrb[16].mxu0 %vm152_vm0, %v1924_v23 }
 0x5f7   :  { %5508 = vmatpush3.bf16.msra.mxu0 %v5505_v60 }
 0x5f8   :  { %5510 = vmatprep.subr.bf16.mxu0 %v5509_v19 }
 0x5fb   :  { %5512 = vmatpush3.bf16.msra.mxu0 %v5509_v19 }
 0x6c5   :  { %v5181_v3 = vpop.f32.mrb[14].mxu0 }
 0x6c6   :  { %v2020_v38 = vadd.f32 %v5181_v3, %v4730_v0  ;;  %v2014_v21 = vpop.f32.mrb[15].mxu0 }
 0x6c7   :  { %v2015_v11 = vadd.f32 %v4730_v0, %v2014_v21 }
 0x6c8   :  { %v2034_v25 = vadd.f32 %v2020_v38, %v6175_v34 }
 0x6c9   :  { %v2033_v42 = vadd.f32 %v2015_v11, %v6173_v33  ;;  %v5184_v44 = vpop.f32.mrb[16].mxu0  ;;  %v2222_v11 = vld [vmem:[%s7126_s10 + $0x30] sm:$0xff] }
 0x6ca   :  { %v2040_v45 = vsel %vm152_vm0, %v2034_v25, 0.0  ;;  %v2055_v47 = vmul.f32 %v2034_v25, %v2034_v25  ;;  %v2030_v63 = vadd.f32 %v5184_v44, %v4730_v0  ;;  %v2024_v24 = vpop.f32.mrb[17].mxu0  ;;  %v4737_v44 = vld [vmem:[#allocation5] ss:$0 sm:$0xff] }
 0x6cb   :  { %v2039_v46 = vsel %vm152_vm0, %v2033_v42, 0.0  ;;  %v2054_v2 = vmul.f32 %v2033_v42, %v2033_v42  ;;  %v2025_v48 = vadd.f32 %v4730_v0, %v2024_v24 }
 0x6cc   :  { %v2059_v52 = vsel %vm152_vm0, %v2055_v47, 0.0  ;;  %v2041_v49 = vadd.f32 %v2040_v45, %v2039_v46  ;;  %v2036_v50 = vadd.f32 %v2030_v63, %v6185_v43 }
 0x6cd   :  { %v2058_v51 = vsel %vm152_vm0, %v2054_v2, 0.0  ;;  %v2035_v34 = vadd.f32 %v2025_v48, %v6181_v41 }
 0x6ce   :  { %v2060_v33 = vadd.f32 %v2059_v52, %v2058_v51  ;;  %v2057_v4 = vmul.f32 %v2036_v50, %v2036_v50  ;;  %v2044_v26 = vsel %vm152_vm0, %v2036_v50, 0.0 }
 0x6cf   :  { %v2042_v59 = vsel %vm152_vm0, %v2035_v34, 0.0  ;;  %v2056_v53 = vmul.f32 %v2035_v34, %v2035_v34 }
 0x6d0   :  { %v2043_v30 = vadd.f32 %v2042_v59, %v2041_v49  ;;  %v2063_v61 = vsel %vm152_vm0, %v2057_v4, 0.0  ;;  %v4750_v4 = vld [vmem:[%s7119_s3 + $0x28] sm:$0xff] }
 0x6d1   :  { %v2061_v57 = vsel %vm152_vm0, %v2056_v53, 0.0  ;;  %v4751_v53 = vld [vmem:[%s7119_s3 + $0x30] sm:$0xff] }
 0x6d2   :  { %v2045_v62 = vadd.f32 %v2044_v26, %v2043_v30  ;;  %v2062_v58 = vadd.f32 %v2061_v57, %v2060_v33  ;;  %v4749_v33 = vld [vmem:[%s7119_s3 + $0x20] sm:$0xff]  ;;  %v4752_v30 = vld [vmem:[%s7119_s3 + $0x38] sm:$0xff] }
 0x6d3   :  { %v5517_v59 = vpack.c.bf16 %v4750_v4, %v4749_v33  ;;  %v5521_v26 = vpack.c.bf16 %v4752_v30, %v4751_v53  ;;  %v4742_v57 = vld [vmem:[%s7127_s11] ss:$0 sm:$0xff] }
 0x6d4   :  { %v2046_v32 = vrot.slane %v2045_v62, 4  ;;  %v2064_v43 = vadd.f32 %v2063_v61, %v2062_v58  ;;  %v4748_v4 = vld [vmem:[%s7129_s13] ss:$0 sm:$0xff] }
 0x6d5   :  { %5518 = vmatprep.subr.bf16.mxu1 %v5517_v59 }
 0x6d6   :  { %v2047_v37 = vadd.f32 %v2046_v32, %v2045_v62  ;;  %v2065_v56 = vrot.slane %v2064_v43, 4 }
 0x6d8   :  { %v2048_v1 = vrot.slane %v2047_v37, 2  ;;  %v2066_v41 = vadd.f32 %v2065_v56, %v2064_v43 }
 0x6da   :  { %v2049_v28 = vadd.f32 %v2048_v1, %v2047_v37  ;;  %v2067_v5 = vrot.slane %v2066_v41, 2 }
 0x6dc   :  { %v2050_v7 = vrot.slane %v2049_v28, 1  ;;  %v2068_v9 = vadd.f32 %v2067_v5, %v2066_v41 }
 0x6de   :  { %v2051_v40 = vadd.f32 %v2050_v7, %v2049_v28  ;;  %v2069_v12 = vrot.slane %v2068_v9, 1 }
 0x6e0   :  { %v2053_v16 = vmul.f32 0.03125, %v2051_v40  ;;  %v2070_v17 = vadd.f32 %v2069_v12, %v2068_v9 }
 0x6e2   :  { %v2071_v55 = vmul.f32 0.03125, %v2070_v17  ;;  %v2072_v20 = vmul.f32 %v2053_v16, %v2053_v16  ;;  %v2076_v22 = vsub.f32 %v2035_v34, %v2053_v16  ;;  %v2074_v23 = vsub.f32 %v2033_v42, %v2053_v16 }
 0x6e3   :  { %v2075_v27 = vsub.f32 %v2034_v25, %v2053_v16  ;;  %v2077_v6 = vsub.f32 %v2036_v50, %v2053_v16  ;;  %v2223_v25 = vld [vmem:[%s7126_s10 + $0x38] sm:$0xff] }
 0x6e4   :  { %v2073_v29 = vsub.f32 %v2071_v55, %v2072_v20  ;;  %v5513_v42 = vpack.c.bf16 %v2223_v25, %v2222_v11 }
 0x6e6   :  { %v2078_v39 = vadd.f32 1e-05, %v2073_v29  ;;  %5514 = vmatprep.subr.bf16.mxu0 %v5513_v42 }
 0x6e7   :  { %5516 = vmatpush3.bf16.msra.mxu0 %v5513_v42 }
 0x6e8   :  { %5881 = vrsqrt.f32 %v2078_v39 }
 0x6f2   :  { %v5882_v54 = vpop.eup %5881 }
 0x6f3   :  { %v2082_v35 = vmul.f32 %v5882_v54, %v2076_v22  ;;  %v2080_v8 = vmul.f32 %v5882_v54, %v2074_v23  ;;  %v2081_v13 = vmul.f32 %v5882_v54, %v2075_v27  ;;  %v2083_v36 = vmul.f32 %v5882_v54, %v2077_v6 }
 0x6f5   :  { %v2090_v60 = vmul.f32 %v4735_v31, %v2080_v8  ;;  %v2091_v18 = vmul.f32 %v4735_v31, %v2081_v13  ;;  %v2092_v15 = vmul.f32 %v4735_v31, %v2082_v35  ;;  %v2093_v3 = vmul.f32 %v4735_v31, %v2083_v36 }
 0x6f7   :  { %v2100_v19 = vadd.f32 %v4736_v14, %v2090_v60  ;;  %v2101_v0 = vadd.f32 %v4736_v14, %v2091_v18  ;;  %v2102_v38 = vadd.f32 %v4736_v14, %v2092_v15  ;;  %v2103_v21 = vadd.f32 %v4736_v14, %v2093_v3 }
 0x6f9   :  { %5193 = vmatprep.mubr.msk.f32.mxu1 %vm152_vm0, %v2100_v19 }
 0x6fa   :  { %5194 = vmatmul.mubr.msk.f32.vlgmr.msra.gmra.mrb[22].mxu1 %vm152_vm0, %v2101_v0 }
 0x6fb   :  { %5196 = vmatprep.mubr.msk.f32.mxu1 %vm152_vm0, %v2102_v38  ;;  %5520 = vmatpush3.bf16.msra.mxu1 %v5517_v59 }
 0x6fc   :  { %5522 = vmatprep.subr.bf16.mxu1 %v5521_v26 }
 0x6fe   :  { %5197 = vmatmul.mubr.msk.f32.gmra.mrb[24].mxu1 %vm152_vm0, %v2103_v21 }
 0x6ff   :  { %5524 = vmatpush3.bf16.msra.mxu1 %v5521_v26 }
 0x7cd   :  { %v5195_v45 = vpop.f32.mrb[22].mxu1 }
 0x7ce   :  { %v2199_v47 = vadd.f32 %v5195_v45, %v4737_v44  ;;  %v2193_v63 = vpop.f32.mrb[23].mxu1 }
 0x7cf   :  { %v2194_v24 = vadd.f32 %v4737_v44, %v2193_v63 }
 0x7d0   :  { %v2213_v48 = vmax.f32 %v2199_v47, 0.0 }
 0x7d1   :  { %v2212_v46 = vmax.f32 %v2194_v24, 0.0  ;;  %v5198_v2 = vpop.f32.mrb[24].mxu1 }
 0x7d2   :  { %v2209_v52 = vadd.f32 %v5198_v2, %v4737_v44  ;;  %v2203_v49 = vpop.f32.mrb[25].mxu1 }
 0x7d3   :  { %v2204_v50 = vadd.f32 %v4737_v44, %v2203_v49  ;;  %5215 = vmatprep.mubr.msk.f32.mxu0 %vm2231_vm5, %v2212_v46  ;;  %v4747_v49 = vld [vmem:[%s7128_s12] ss:$0 sm:$0xff] }
 0x7d4   :  { %5216 = vmatmul.mubr.msk.f32.vlgmr.msra.gmra.mrb[18].mxu0 %vm2231_vm5, %v2213_v48  ;;  %v2215_v34 = vmax.f32 %v2209_v52, 0.0 }
 0x7d5   :  { %v2214_v51 = vmax.f32 %v2204_v50, 0.0 }
 0x7d7   :  { %5218 = vmatprep.mubr.msk.f32.mxu0 %vm2231_vm5, %v2214_v51 }
 0x7d8   :  { %5219 = vmatmul.mubr.msk.f32.gmra.mrb[20].mxu0 %vm2231_vm5, %v2215_v34 }
 0x8a7   :  { %v5217_v62 = vpop.f32.mrb[18].mxu0 }
 0x8a8   :  { %v2316_v58 = vadd.f32 %v5217_v62, %v4742_v57  ;;  %v2310_v61 = vpop.f32.mrb[19].mxu0 }
 0x8a9   :  { %v2311_v32 = vadd.f32 %v4742_v57, %v2310_v61 }
 0x8aa   :  { %v2330_v43 = vadd.f32 %v2316_v58, %v2101_v0 }
 0x8ab   :  { %v2329_v37 = vadd.f32 %v2311_v32, %v2100_v19  ;;  %v5220_v56 = vpop.f32.mrb[20].mxu0 }
 0x8ac   :  { %v2336_v1 = vsel %vm152_vm0, %v2330_v43, 0.0  ;;  %v2350_v41 = vmul.f32 %v2330_v43, %v2330_v43  ;;  %v2326_v28 = vadd.f32 %v5220_v56, %v4742_v57  ;;  %v2320_v5 = vpop.f32.mrb[21].mxu0 }
 0x8ad   :  { %v2335_v7 = vsel %vm152_vm0, %v2329_v37, 0.0  ;;  %v2349_v9 = vmul.f32 %v2329_v37, %v2329_v37  ;;  %v2321_v40 = vadd.f32 %v4742_v57, %v2320_v5 }
 0x8ae   :  { %v2354_v12 = vsel %vm152_vm0, %v2350_v41, 0.0  ;;  %v2337_v16 = vadd.f32 %v2336_v1, %v2335_v7  ;;  %v2332_v17 = vadd.f32 %v2326_v28, %v2103_v21 }
 0x8af   :  { %v2353_v55 = vsel %vm152_vm0, %v2349_v9, 0.0  ;;  %v2331_v20 = vadd.f32 %v2321_v40, %v2102_v38 }
 0x8b0   :  { %v2355_v22 = vadd.f32 %v2354_v12, %v2353_v55  ;;  %v2352_v23 = vmul.f32 %v2332_v17, %v2332_v17  ;;  %v2340_v39 = vsel %vm152_vm0, %v2332_v17, 0.0 }
 0x8b1   :  { %v2338_v27 = vsel %vm152_vm0, %v2331_v20, 0.0  ;;  %v2351_v6 = vmul.f32 %v2331_v20, %v2331_v20 }
 0x8b2   :  { %v2339_v29 = vadd.f32 %v2338_v27, %v2337_v16  ;;  %v2358_v8 = vsel %vm152_vm0, %v2352_v23, 0.0 }
 0x8b3   :  { %v2356_v54 = vsel %vm152_vm0, %v2351_v6, 0.0 }
 0x8b4   :  { %v2341_v31 = vadd.f32 %v2340_v39, %v2339_v29  ;;  %v2357_v35 = vadd.f32 %v2356_v54, %v2355_v22 }
 0x8b6   :  { %v2342_v13 = vrot.slane %v2341_v31, 4  ;;  %v2359_v36 = vadd.f32 %v2358_v8, %v2357_v35 }
 0x8b8   :  { %v2343_v14 = vadd.f32 %v2342_v13, %v2341_v31  ;;  %v2360_v60 = vrot.slane %v2359_v36, 4 }
 0x8ba   :  { %v2344_v18 = vrot.slane %v2343_v14, 2  ;;  %v2361_v15 = vadd.f32 %v2360_v60, %v2359_v36 }
 0x8bc   :  { %v2345_v19 = vadd.f32 %v2344_v18, %v2343_v14  ;;  %v2362_v0 = vrot.slane %v2361_v15, 2 }
 0x8be   :  { %v2346_v3 = vrot.slane %v2345_v19, 1  ;;  %v2363_v38 = vadd.f32 %v2362_v0, %v2361_v15 }
 0x8c0   :  { %v2347_v21 = vadd.f32 %v2346_v3, %v2345_v19  ;;  %v2364_v11 = vrot.slane %v2363_v38, 1 }
 0x8c2   :  { %v2348_v25 = vmul.f32 0.03125, %v2347_v21  ;;  %v2365_v42 = vadd.f32 %v2364_v11, %v2363_v38 }
 0x8c4   :  { %v2366_v44 = vmul.f32 0.03125, %v2365_v42  ;;  %v2367_v45 = vmul.f32 %v2348_v25, %v2348_v25  ;;  %v2371_v47 = vsub.f32 %v2331_v20, %v2348_v25  ;;  %v2369_v63 = vsub.f32 %v2329_v37, %v2348_v25 }
 0x8c5   :  { %v2370_v24 = vsub.f32 %v2330_v43, %v2348_v25  ;;  %v2372_v46 = vsub.f32 %v2332_v17, %v2348_v25 }
 0x8c6   :  { %v2368_v2 = vsub.f32 %v2366_v44, %v2367_v45 }
 0x8c8   :  { %v2373_v48 = vadd.f32 1e-05, %v2368_v2 }
 0x8ca   :  { %5883 = vrsqrt.f32 %v2373_v48 }
 0x8d4   :  { %v5884_v52 = vpop.eup %5883 }
 0x8d5   :  { %v2377_v50 = vmul.f32 %v5884_v52, %v2371_v47  ;;  %v2375_v51 = vmul.f32 %v5884_v52, %v2369_v63  ;;  %v2376_v34 = vmul.f32 %v5884_v52, %v2370_v24  ;;  %v2378_v33 = vmul.f32 %v5884_v52, %v2372_v46 }
 0x8d7   :  { %v2385_v59 = vmul.f32 %v4747_v49, %v2375_v51  ;;  %v2386_v53 = vmul.f32 %v4747_v49, %v2376_v34  ;;  %v2387_v30 = vmul.f32 %v4747_v49, %v2377_v50  ;;  %v2388_v62 = vmul.f32 %v4747_v49, %v2378_v33 }
 0x8d9   :  { %v6645_v26 = vadd.f32 %v4748_v4, %v2385_v59  ;;  %v6647_v57 = vadd.f32 %v4748_v4, %v2386_v53  ;;  %v6651_v58 = vadd.f32 %v4748_v4, %v2387_v30  ;;  %v6657_v61 = vadd.f32 %v4748_v4, %v2388_v62 }
 0x8db   :  { %5229 = vmatprep.mubr.msk.f32.mxu1 %vm152_vm0, %v6645_v26 }
 0x8dc   :  { %5230 = vmatmul.mubr.msk.f32.vlgmr.msra.gmra.mrb[26].mxu1 %vm152_vm0, %v6647_v57 }
 0x8dd   :  { %5232 = vmatprep.mubr.msk.f32.mxu1 %vm152_vm0, %v6651_v58 }
 0x8e0   :  { %5233 = vmatmul.mubr.msk.f32.gmra.mrb[28].mxu1 %vm152_vm0, %v6657_v61 }
 0x9af   :  { %v6661_v32 = vpop.f32.mrb[26].mxu1 }
 0x9b0   :  { %2507 = vrot.lane.b32.xlu0 %v6661_v32, %s6031_s1  ;;  %v2482_v43 = vpop.f32.mrb[27].mxu1 }
 0x9b1   :  { %2505 = vrot.lane.b32.xlu1 %v2482_v43, %s6031_s1  ;;  %5239 = vmatprep.mubr.msk.f32.mxu1 %vm282_vm1, %v2482_v43  ;;  %v5737_v37 = vpack.i.bf16 %v6661_v32, %v2482_v43 }
 0x9b3   :  { %v5234_v56 = vpop.f32.mrb[28].mxu1 }
 0x9b4   :  { %2511 = vrot.lane.b32.xlu0 %v5234_v56, %s6031_s1  ;;  %v2492_v1 = vpop.f32.mrb[29].mxu1 }
 0x9b5   :  { %2509 = vrot.lane.b32.xlu1 %v2492_v1, %s6031_s1  ;;  %5246 = vmatprep.mubr.msk.f32.mxu0 %vm282_vm1, %v2492_v1  ;;  %v5742_v41 = vpack.i.bf16 %v5234_v56, %v2492_v1 }
 0x9b8   :  { %2515 = vrot.lane.b32.xlu0 %v6661_v32, %s6032_s2 }
 0x9b9   :  { %2513 = vrot.lane.b32.xlu1 %v2482_v43, %s6032_s2 }
 0x9bc   :  { %2519 = vrot.lane.b32.xlu0 %v5234_v56, %s6032_s2 }
 0x9bd   :  { %2517 = vrot.lane.b32.xlu1 %v2492_v1, %s6032_s2 }
 0x9c0   :  { %2523 = vrot.lane.b32.xlu0 %v6661_v32, %s6033_s26 }
 0x9c1   :  { %2521 = vrot.lane.b32.xlu1 %v2482_v43, %s6033_s26 }
 0x9c4   :  { %2527 = vrot.lane.b32.xlu0 %v5234_v56, %s6033_s26 }
 0x9c5   :  { %2525 = vrot.lane.b32.xlu1 %v2492_v1, %s6033_s26 }
 0x9c8   :  { %5743 = vrot.lane.b32.xlu0 %v5742_v41, %s6034_s27 }
 0x9c9   :  { %5738 = vrot.lane.b32.xlu1 %v5737_v37, %s6034_s27 }
 0xa22   :  { %v6683_v28 = vpop.permute.xlu0 %2507 }
 0xa23   :  { %v2506_v5 = vpop.permute.xlu1 %2505 }
 0xa24   :  { %v5747_v7 = vpack.i.bf16 %v6683_v28, %v2506_v5 }
 0xa26   :  { %v6686_v9 = vpop.permute.xlu0 %2511  ;;  %5748 = vrot.lane.b32.xlu1 %v5747_v7, %s6034_s27 }
 0xa27   :  { %v2510_v40 = vpop.permute.xlu1 %2509 }
 0xa28   :  { %v5752_v12 = vpack.i.bf16 %v6686_v9, %v2510_v40 }
 0xa2a   :  { %v6690_v16 = vpop.permute.xlu0 %2515  ;;  %5753 = vrot.lane.b32.xlu0 %v5752_v12, %s6034_s27 }
 0xa2b   :  { %v2514_v17 = vpop.permute.xlu1 %2513 }
 0xa2c   :  { %v6694_v55 = vpack.i.bf16 %v6690_v16, %v2514_v17 }
 0xa2e   :  { %v6696_v20 = vpop.permute.xlu0 %2519  ;;  %5758 = vrot.lane.b32.xlu1 %v6694_v55, %s6034_s27 }
 0xa2f   :  { %v2518_v22 = vpop.permute.xlu1 %2517 }
 0xa30   :  { %v6701_v23 = vpack.i.bf16 %v6696_v20, %v2518_v22 }
 0xa32   :  { %v6703_v27 = vpop.permute.xlu0 %2523  ;;  %5763 = vrot.lane.b32.xlu0 %v6701_v23, %s6034_s27 }
 0xa33   :  { %v6707_v6 = vpop.permute.xlu1 %2521 }
 0xa34   :  { %v6711_v29 = vpack.i.bf16 %v6703_v27, %v6707_v6 }
 0xa36   :  { %v6713_v39 = vpop.permute.xlu0 %2527  ;;  %5768 = vrot.lane.b32.xlu1 %v6711_v29, %s6034_s27 }
 0xa37   :  { %v6717_v54 = vpop.permute.xlu1 %2525 }
 0xa38   :  { %v6721_v31 = vpack.i.bf16 %v6713_v39, %v6717_v54 }
 0xa3a   :  { %v5744_v35 = vpop.permute.xlu0 %5743  ;;  %5783 = vrot.lane.b32.xlu1 %v5742_v41, %s6035_s29  ;;  %5773 = vrot.lane.b32.xlu0 %v6721_v31, %s6034_s27 }
 0xa3b   :  { %v5746_v8 = vunpack.i.h.bf16 %v5744_v35  ;;  %v5745_v13 = vunpack.i.l.bf16 %v5744_v35  ;;  %v5739_v36 = vpop.permute.xlu1 %5738 }
 0xa3c   :  { %v5741_v14 = vunpack.i.h.bf16 %v5739_v36  ;;  %v5740_v60 = vunpack.i.l.bf16 %v5739_v36 }
 0xa3d   :  { %v5531_v18 = vpack.c.bf16 %v5746_v8, %v5745_v13 }
 0xa3e   :  { %v5525_v15 = vpack.c.bf16 %v5741_v14, %v5740_v60  ;;  %5788 = vrot.lane.b32.xlu1 %v5747_v7, %s6035_s29  ;;  %5778 = vrot.lane.b32.xlu0 %v5737_v37, %s6035_s29 }
 0xa3f   :  { %5533 = vmatprep.subr.msk.bf16.mxu0 %vm6256_vm2, %v5531_v18 }
 0xa40   :  { %5527 = vmatprep.subr.msk.bf16.mxu1 %vm6256_vm2, %v5525_v15  ;;  %5536 = vmatpush3.bf16.xpose.msk.msra.mxu0 %vm6256_vm2, %v5531_v18 }
 0xa41   :  { %5530 = vmatpush3.bf16.xpose.msk.msra.mxu1 %vm6256_vm2, %v5525_v15 }
 0xa42   :  { %5793 = vrot.lane.b32.xlu0 %v5752_v12, %s6035_s29 }
 0xa47   :  { %5247 = vmatmul.mubr.msk.f32.vlgmr.msra.gmra.mrb[22].mxu0 %vm282_vm1, %v5234_v56 }
 0xa48   :  { %5240 = vmatmul.mubr.msk.f32.vlgmr.msra.gmra.mrb[30].mxu1 %vm282_vm1, %v6661_v32  ;;  %5260 = vmatprep.mubr.msk.f32.mxu0 %vm282_vm1, %v2510_v40 }
 0xa49   :  { %5253 = vmatprep.mubr.msk.f32.mxu1 %vm282_vm1, %v2506_v5 }
 0xa98   :  { %v5749_v19 = vpop.permute.xlu1 %5748 }
 0xa99   :  { %v5751_v0 = vunpack.i.h.bf16 %v5749_v19  ;;  %v5750_v3 = vunpack.i.l.bf16 %v5749_v19 }
 0xa9b   :  { %v5537_v38 = vpack.c.bf16 %v5751_v0, %v5750_v3 }
 0xa9c   :  { %v5754_v21 = vpop.permute.xlu0 %5753 }
 0xa9d   :  { %v5756_v11 = vunpack.i.h.bf16 %v5754_v21  ;;  %v5755_v25 = vunpack.i.l.bf16 %v5754_v21  ;;  %5539 = vmatprep.subr.msk.bf16.mxu1 %vm6256_vm2, %v5537_v38 }
 0xa9e   :  { %5542 = vmatpush3.bf16.xpose.msk.msra.mxu1 %vm6256_vm2, %v5537_v38 }
 0xa9f   :  { %v5543_v42 = vpack.c.bf16 %v5756_v11, %v5755_v25 }
 0xaa0   :  { %v5759_v44 = vpop.permute.xlu1 %5758 }
 0xaa1   :  { %v5761_v45 = vunpack.i.h.bf16 %v5759_v44  ;;  %v5760_v47 = vunpack.i.l.bf16 %v5759_v44  ;;  %5545 = vmatprep.subr.msk.bf16.mxu0 %vm6256_vm2, %v5543_v42 }
 0xaa2   :  { %5548 = vmatpush3.bf16.xpose.msk.msra.mxu0 %vm6256_vm2, %v5543_v42 }
 0xaa3   :  { %v5549_v63 = vpack.c.bf16 %v5761_v45, %v5760_v47 }
 0xaa4   :  { %v5764_v24 = vpop.permute.xlu0 %5763 }
 0xaa5   :  { %v5766_v46 = vunpack.i.h.bf16 %v5764_v24  ;;  %v5765_v2 = vunpack.i.l.bf16 %v5764_v24  ;;  %5254 = vmatmul.mubr.msk.f32.vlgmr.msra.gmra.mrb[32].mxu1 %vm282_vm1, %v6683_v28  ;;  %5551 = vmatprep.subr.msk.bf16.mxu1 %vm6256_vm2, %v5549_v63 }
 0xaa6   :  { %5554 = vmatpush3.bf16.xpose.msk.msra.mxu1 %vm6256_vm2, %v5549_v63  ;;  %5267 = vmatprep.mubr.msk.f32.mxu1 %vm282_vm1, %v2514_v17 }
 0xaa7   :  { %v5555_v48 = vpack.c.bf16 %v5766_v46, %v5765_v2 }
 0xaa8   :  { %v5769_v52 = vpop.permute.xlu1 %5768 }
 0xaa9   :  { %v5771_v49 = vunpack.i.h.bf16 %v5769_v52  ;;  %v5770_v50 = vunpack.i.l.bf16 %v5769_v52  ;;  %5261 = vmatmul.mubr.msk.f32.vlgmr.msra.gmra.mrb[24].mxu0 %vm282_vm1, %v6686_v9  ;;  %5557 = vmatprep.subr.msk.bf16.mxu0 %vm6256_vm2, %v5555_v48 }
 0xaaa   :  { %5560 = vmatpush3.bf16.xpose.msk.msra.mxu0 %vm6256_vm2, %v5555_v48  ;;  %5274 = vmatprep.mubr.msk.f32.mxu0 %vm282_vm1, %v2518_v22 }
 0xaab   :  { %v5561_v51 = vpack.c.bf16 %v5771_v49, %v5770_v50 }
 0xaac   :  { %v5774_v34 = vpop.permute.xlu0 %5773  ;;  %v5784_v33 = vpop.permute.xlu1 %5783 }
 0xaad   :  { %v5776_v4 = vunpack.i.h.bf16 %v5774_v34  ;;  %v5775_v59 = vunpack.i.l.bf16 %v5774_v34  ;;  %5268 = vmatmul.mubr.msk.f32.vlgmr.msra.gmra.mrb[34].mxu1 %vm282_vm1, %v6690_v16  ;;  %5563 = vmatprep.subr.msk.bf16.mxu1 %vm6256_vm2, %v5561_v51  ;;  %v5786_v30 = vunpack.i.h.bf16 %v5784_v33  ;;  %v5785_v62 = vunpack.i.l.bf16 %v5784_v33 }
 0xaae   :  { %5566 = vmatpush3.bf16.xpose.msk.msra.mxu1 %vm6256_vm2, %v5561_v51  ;;  %5281 = vmatprep.mubr.msk.f32.mxu1 %vm282_vm1, %v6707_v6 }
 0xaaf   :  { %v5567_v53 = vpack.c.bf16 %v5776_v4, %v5775_v59  ;;  %v6780_v7 = vpack.c.bf16 %v5786_v30, %v5785_v62 }
 0xab0   :  { %v5779_v32 = vpop.permute.xlu0 %5778  ;;  %v5789_v43 = vpop.permute.xlu1 %5788 }
 0xab1   :  { %v5781_v37 = vunpack.i.h.bf16 %v5779_v32  ;;  %v5780_v56 = vunpack.i.l.bf16 %v5779_v32  ;;  %v5791_v1 = vunpack.i.h.bf16 %v5789_v43  ;;  %v5790_v41 = vunpack.i.l.bf16 %v5789_v43  ;;  %5275 = vmatmul.mubr.msk.f32.vlgmr.msra.gmra.mrb[26].mxu0 %vm282_vm1, %v6696_v20  ;;  %5569 = vmatprep.subr.msk.bf16.mxu0 %vm6256_vm2, %v5567_v53 }
 0xab2   :  { %5572 = vmatpush3.bf16.xpose.msk.msra.mxu0 %vm6256_vm2, %v5567_v53  ;;  %5288 = vmatprep.mubr.msk.f32.mxu0 %vm282_vm1, %v6717_v54 }
 0xab3   :  { %v5573_v28 = vpack.c.bf16 %v5781_v37, %v5780_v56  ;;  %v5581_v5 = vpack.c.bf16 %v5791_v1, %v5790_v41 }
 0xab4   :  { %v6855_v43 = vpop.permute.xlu0 %5793 }
 0xab5   :  { %5282 = vmatmul.mubr.msk.f32.vlgmr.msra.gmra.mrb[36].mxu1 %vm282_vm1, %v6703_v27  ;;  %5574 = vmatprep.subr.bf16.mxu1 %v5573_v28 }
 0xab6   :  { %5582 = vmatprep.subr.bf16.mxu0 %v5581_v5  ;;  %5576 = vmatpush3.bf16.msra.mxu1 %v5573_v28 }
 0xab7   :  { %5578 = vmatprep.subr.bf16.mxu1 %v6780_v7 }
 0xab9   :  { %5289 = vmatmul.mubr.msk.f32.vlgmr.msra.gmra.mrb[28].mxu0 %vm282_vm1, %v6713_v39 }
 0xaba   :  { %5584 = vmatpush3.bf16.msra.mxu0 %v5581_v5 }
 0xb1a   :  { %v5248_v10 = vpop.f32.mrb[22].mxu0 }
 0xb1b   :  { %v5241_v9 = vpop.f32.mrb[30].mxu1  ;;  %v2694_v40 = vpop.f32.mrb[23].mxu0  ;;  %v6791_v20 = vmul.f32 0.35355338, %v5248_v10 }
 0xb1c   :  { %v6787_v12 = vmul.f32 0.35355338, %v5241_v9  ;;  %v2607_v16 = vpop.f32.mrb[31].mxu1  ;;  %v6797_v6 = vmul.f32 0.35355338, %v2694_v40 }
 0xb1d   :  { %v6789_v17 = vmul.f32 0.35355338, %v2607_v16  ;;  %v3250_v39 = vsel %vm991_vm3, %v6791_v20, -inf }
 0xb1e   :  { %v3244_v22 = vsel %vm991_vm3, %v6787_v12, -inf  ;;  %v3247_v54 = vsel %vm991_vm3, %v6797_v6, -inf }
 0xb1f   :  { %3245 = vmax.xlane.f32.xlu0 %v3244_v22  ;;  %v3241_v27 = vsel %vm991_vm3, %v6789_v17, -inf }
 0xb20   :  { %3242 = vmax.xlane.f32.xlu1 %v3241_v27 }
 0xb23   :  { %3251 = vmax.xlane.f32.xlu0 %v3250_v39 }
 0xb27   :  { %3248 = vmax.xlane.f32.xlu0 %v3247_v54 }
 0xb78   :  { %v5255_v35 = vpop.f32.mrb[32].mxu1 }
 0xb79   :  { %v6803_v8 = vmul.f32 0.35355338, %v5255_v35  ;;  %v2781_v13 = vpop.f32.mrb[33].mxu1 }
 0xb7a   :  { %v6805_v36 = vmul.f32 0.35355338, %v2781_v13 }
 0xb7b   :  { %v3256_v14 = vsel %vm991_vm3, %v6803_v8, -inf }
 0xb7c   :  { %3257 = vmax.xlane.f32.xlu1 %v3256_v14  ;;  %v5262_v60 = vpop.f32.mrb[24].mxu0  ;;  %v3253_v0 = vsel %vm991_vm3, %v6805_v36, -inf }
 0xb7d   :  { %v6809_v18 = vmul.f32 0.35355338, %v5262_v60  ;;  %v2868_v15 = vpop.f32.mrb[25].mxu0 }
 0xb7e   :  { %v6811_v19 = vmul.f32 0.35355338, %v2868_v15 }
 0xb7f   :  { %v3262_v3 = vsel %vm991_vm3, %v6809_v18, -inf }
 0xb80   :  { %3254 = vmax.xlane.f32.xlu1 %v3253_v0  ;;  %v5269_v38 = vpop.f32.mrb[34].mxu1  ;;  %3263 = vmax.xlane.f32.xlu0 %v3262_v3  ;;  %v3259_v44 = vsel %vm991_vm3, %v6811_v19, -inf }
 0xb81   :  { %v6817_v21 = vmul.f32 0.35355338, %v5269_v38  ;;  %v2955_v11 = vpop.f32.mrb[35].mxu1 }
 0xb82   :  { %v6819_v25 = vmul.f32 0.35355338, %v2955_v11 }
 0xb83   :  { %v3268_v42 = vsel %vm991_vm3, %v6817_v21, -inf }
 0xb84   :  { %3269 = vmax.xlane.f32.xlu1 %v3268_v42  ;;  %3260 = vmax.xlane.f32.xlu0 %v3259_v44  ;;  %v5276_v45 = vpop.f32.mrb[26].mxu0  ;;  %v3265_v46 = vsel %vm991_vm3, %v6819_v25, -inf }
 0xb85   :  { %v6825_v47 = vmul.f32 0.35355338, %v5276_v45  ;;  %v3042_v63 = vpop.f32.mrb[27].mxu0 }
 0xb86   :  { %v6827_v24 = vmul.f32 0.35355338, %v3042_v63 }
 0xb87   :  { %v3274_v2 = vsel %vm991_vm3, %v6825_v47, -inf }
 0xb88   :  { %3266 = vmax.xlane.f32.xlu1 %v3265_v46  ;;  %v5283_v48 = vpop.f32.mrb[36].mxu1  ;;  %3275 = vmax.xlane.f32.xlu0 %v3274_v2  ;;  %v3271_v34 = vsel %vm991_vm3, %v6827_v24, -inf }
 0xb89   :  { %v6833_v52 = vmul.f32 0.35355338, %v5283_v48  ;;  %v3129_v49 = vpop.f32.mrb[37].mxu1 }
 0xb8a   :  { %v6835_v50 = vmul.f32 0.35355338, %v3129_v49 }
 0xb8b   :  { %v3280_v51 = vsel %vm991_vm3, %v6833_v52, -inf }
 0xb8c   :  { %3281 = vmax.xlane.f32.xlu1 %v3280_v51  ;;  %3272 = vmax.xlane.f32.xlu0 %v3271_v34  ;;  %v5290_v33 = vpop.f32.mrb[28].mxu0  ;;  %v3277_v30 = vsel %vm991_vm3, %v6835_v50, -inf }
 0xb8d   :  { %v3216_v4 = vpop.f32.mrb[29].mxu0  ;;  %v6843_v53 = vmul.f32 0.35355338, %v5290_v33 }
 0xb8e   :  { %v6841_v59 = vmul.f32 0.35355338, %v3216_v4 }
 0xb8f   :  { %v3286_v32 = vsel %vm991_vm3, %v6843_v53, -inf }
 0xb90   :  { %3278 = vmax.xlane.f32.xlu1 %v3277_v30  ;;  %v3283_v62 = vsel %vm991_vm3, %v6841_v59, -inf }
 0xb91   :  { %3284 = vmax.xlane.f32.xlu0 %v3283_v62 }
 0xb94   :  { %3287 = vmax.xlane.f32.xlu1 %v3286_v32 }
 0xba5   :  { %5798 = vrot.lane.b32.xlu1 %v6694_v55, %s6035_s29 }
 0xba7   :  { %5803 = vrot.lane.b32.xlu0 %v6701_v23, %s6035_s29 }
 0xbac   :  { %v3246_v37 = vpop.xlane.xlu0 %3245 }
 0xbad   :  { %v3243_v56 = vpop.xlane.xlu1 %3242  ;;  %v3290_v28 = vsub.f32 %v6787_v12, %v3246_v37 }
 0xbae   :  { %v3289_v1 = vsub.f32 %v6789_v17, %v3243_v56 }
 0xbaf   :  { %v3307_v40 = vmul.f32 1.442695, %v3290_v28 }
 0xbb0   :  { %v3252_v41 = vpop.xlane.xlu0 %3251  ;;  %v3305_v5 = vmul.f32 1.442695, %v3289_v1 }
 0xbb1   :  { %v3292_v10 = vsub.f32 %v6791_v20, %v3252_v41 }
 0xbb2   :  { %5885 = vpow2.f32 %v3305_v5 }
 0xbb3   :  { %v3311_v16 = vmul.f32 1.442695, %v3292_v10  ;;  %5887 = vpow2.f32 %v3307_v40 }
 0xbb4   :  { %v3249_v9 = vpop.xlane.xlu0 %3248 }
 0xbb5   :  { %v3291_v55 = vsub.f32 %v6797_v6, %v3249_v9  ;;  %5889 = vpow2.f32 %v3311_v16 }
 0xbb7   :  { %v3309_v23 = vmul.f32 1.442695, %v3291_v55 }
 0xbb9   :  { %5891 = vpow2.f32 %v3309_v23 }
 0xbbc   :  { %v6861_v22 = vpop.eup %5885 }
 0xbbd   :  { %v6863_v27 = vpop.eup %5887  ;;  %v3337_v12 = vsel %vm991_vm3, %v6861_v22, 0.0 }
 0xbbe   :  { %v3340_v20 = vsel %vm991_vm3, %v6863_v27, 0.0 }
 0xbbf   :  { %v6867_v17 = vpop.eup %5889 }
 0xbc0   :  { %v3346_v6 = vsel %vm991_vm3, %v6867_v17, 0.0 }
 0xbc3   :  { %v6873_v39 = vpop.eup %5891 }
 0xbc4   :  { %v3343_v54 = vsel %vm991_vm3, %v6873_v39, 0.0 }
 0xbc6   :  { %3338 = vadd.xlane.f32.xlu0 %v3337_v12 }
 0xbc9   :  { %3341 = vadd.xlane.f32.xlu1 %v3340_v20 }
 0xbca   :  { %3347 = vadd.xlane.f32.xlu0 %v3346_v6 }
 0xbce   :  { %3344 = vadd.xlane.f32.xlu0 %v3343_v54 }
 0xc09   :  { %v3258_v35 = vpop.xlane.xlu1 %3257 }
 0xc0a   :  { %v3294_v13 = vsub.f32 %v6803_v8, %v3258_v35 }
 0xc0c   :  { %v3315_v14 = vmul.f32 1.442695, %v3294_v13 }
 0xc0d   :  { %v3255_v60 = vpop.xlane.xlu1 %3254  ;;  %v3264_v15 = vpop.xlane.xlu0 %3263 }
 0xc0e   :  { %5893 = vpow2.f32 %v3315_v14  ;;  %v3293_v0 = vsub.f32 %v6805_v36, %v3255_v60  ;;  %v3296_v3 = vsub.f32 %v6809_v18, %v3264_v15 }
 0xc10   :  { %v3313_v38 = vmul.f32 1.442695, %v3293_v0  ;;  %v3319_v11 = vmul.f32 1.442695, %v3296_v3 }
 0xc11   :  { %v3270_v42 = vpop.xlane.xlu1 %3269  ;;  %v3261_v44 = vpop.xlane.xlu0 %3260 }
 0xc12   :  { %5895 = vpow2.f32 %v3313_v38  ;;  %v3298_v45 = vsub.f32 %v6817_v21, %v3270_v42  ;;  %v3295_v63 = vsub.f32 %v6811_v19, %v3261_v44 }
 0xc13   :  { %5897 = vpow2.f32 %v3319_v11 }
 0xc14   :  { %v3323_v46 = vmul.f32 1.442695, %v3298_v45  ;;  %v3317_v8 = vmul.f32 1.442695, %v3295_v63 }
 0xc15   :  { %v3267_v2 = vpop.xlane.xlu1 %3266  ;;  %v3276_v48 = vpop.xlane.xlu0 %3275 }
 0xc16   :  { %5899 = vpow2.f32 %v3323_v46  ;;  %v3297_v49 = vsub.f32 %v6819_v25, %v3267_v2  ;;  %v3300_v36 = vsub.f32 %v6825_v47, %v3276_v48 }
 0xc17   :  { %5901 = vpow2.f32 %v3317_v8 }
 0xc18   :  { %v6884_v18 = vpop.eup %5893  ;;  %v3321_v51 = vmul.f32 1.442695, %v3297_v49  ;;  %v3327_v34 = vmul.f32 1.442695, %v3300_v36 }
 0xc19   :  { %v3282_v33 = vpop.xlane.xlu1 %3281  ;;  %v3273_v4 = vpop.xlane.xlu0 %3272  ;;  %v3352_v19 = vsel %vm991_vm3, %v6884_v18, 0.0 }
 0xc1a   :  { %5903 = vpow2.f32 %v3321_v51  ;;  %v3302_v21 = vsub.f32 %v6833_v52, %v3282_v33  ;;  %v3299_v30 = vsub.f32 %v6827_v24, %v3273_v4  ;;  %3353 = vadd.xlane.f32.xlu1 %v3352_v19  ;;  %v5796_v51 = vunpack.i.h.bf16 %v6855_v43 }
 0xc1b   :  { %5905 = vpow2.f32 %v3327_v34  ;;  %v5795_v34 = vunpack.i.l.bf16 %v6855_v43 }
 0xc1c   :  { %v6890_v25 = vpop.eup %5895  ;;  %v3331_v47 = vmul.f32 1.442695, %v3302_v21  ;;  %v3325_v62 = vmul.f32 1.442695, %v3299_v30 }
 0xc1d   :  { %v6892_v32 = vpop.eup %5897  ;;  %v3279_v37 = vpop.xlane.xlu1 %3278  ;;  %v3349_v56 = vsel %vm991_vm3, %v6890_v25, 0.0  ;;  %v5585_v33 = vpack.c.bf16 %v5796_v51, %v5795_v34 }
 0xc1e   :  { %5907 = vpow2.f32 %v3331_v47  ;;  %v3301_v1 = vsub.f32 %v6835_v50, %v3279_v37  ;;  %3350 = vadd.xlane.f32.xlu1 %v3349_v56  ;;  %v3358_v52 = vsel %vm991_vm3, %v6892_v32, 0.0  ;;  %v3285_v24 = vpop.xlane.xlu0 %3284 }
 0xc1f   :  { %5909 = vpow2.f32 %v3325_v62  ;;  %3359 = vadd.xlane.f32.xlu0 %v3358_v52  ;;  %v3303_v41 = vsub.f32 %v6841_v59, %v3285_v24 }
 0xc20   :  { %v6900_v28 = vpop.eup %5899  ;;  %v3329_v5 = vmul.f32 1.442695, %v3301_v1 }
 0xc21   :  { %v6902_v10 = vpop.eup %5901  ;;  %v3333_v9 = vmul.f32 1.442695, %v3303_v41  ;;  %v3288_v40 = vpop.xlane.xlu1 %3287  ;;  %v3364_v16 = vsel %vm991_vm3, %v6900_v28, 0.0 }
 0xc22   :  { %5911 = vpow2.f32 %v3329_v5  ;;  %v3304_v50 = vsub.f32 %v6843_v53, %v3288_v40  ;;  %3365 = vadd.xlane.f32.xlu1 %v3364_v16  ;;  %v3355_v55 = vsel %vm991_vm3, %v6902_v10, 0.0  ;;  %v5804_v63 = vpop.permute.xlu0 %5803 }
 0xc23   :  { %5913 = vpow2.f32 %v3333_v9  ;;  %3356 = vadd.xlane.f32.xlu0 %v3355_v55  ;;  %v5806_v21 = vunpack.i.h.bf16 %v5804_v63  ;;  %v5805_v30 = vunpack.i.l.bf16 %v5804_v63 }
 0xc24   :  { %v6909_v59 = vpop.eup %5903  ;;  %v3335_v23 = vmul.f32 1.442695, %v3304_v50 }
 0xc25   :  { %v6911_v12 = vpop.eup %5905  ;;  %v5799_v20 = vpop.permute.xlu1 %5798  ;;  %v3361_v6 = vsel %vm991_vm3, %v6909_v59, 0.0  ;;  %v5593_v43 = vpack.c.bf16 %v5806_v21, %v5805_v30 }
 0xc26   :  { %5915 = vpow2.f32 %v3335_v23  ;;  %v5801_v54 = vunpack.i.h.bf16 %v5799_v20  ;;  %v5800_v35 = vunpack.i.l.bf16 %v5799_v20  ;;  %3362 = vadd.xlane.f32.xlu1 %v3361_v6  ;;  %v3370_v53 = vsel %vm991_vm3, %v6911_v12, 0.0 }
 0xc27   :  { %3371 = vadd.xlane.f32.xlu0 %v3370_v53 }
 0xc28   :  { %v6917_v13 = vpop.eup %5907  ;;  %v6919_v14 = vpack.c.bf16 %v5801_v54, %v5800_v35 }
 0xc29   :  { %v6921_v60 = vpop.eup %5909  ;;  %v3376_v15 = vsel %vm991_vm3, %v6917_v13, 0.0 }
 0xc2a   :  { %3377 = vadd.xlane.f32.xlu1 %v3376_v15  ;;  %5590 = vmatprep.subr.bf16.mxu0 %v6919_v14  ;;  %v3367_v0 = vsel %vm991_vm3, %v6921_v60, 0.0 }
 0xc2b   :  { %3368 = vadd.xlane.f32.xlu0 %v3367_v0 }
 0xc2c   :  { %v6928_v3 = vpop.eup %5911 }
 0xc2d   :  { %v6930_v38 = vpop.eup %5913  ;;  %v3373_v11 = vsel %vm991_vm3, %v6928_v3, 0.0 }
 0xc2e   :  { %3374 = vadd.xlane.f32.xlu1 %v3373_v11  ;;  %v3379_v42 = vsel %vm991_vm3, %v6930_v38, 0.0 }
 0xc2f   :  { %3380 = vadd.xlane.f32.xlu0 %v3379_v42 }
 0xc30   :  { %v6936_v44 = vpop.eup %5915 }
 0xc31   :  { %v3382_v45 = vsel %vm991_vm3, %v6936_v44, 0.0 }
 0xc32   :  { %3383 = vadd.xlane.f32.xlu1 %v3382_v45 }
 0xc43   :  { %5808 = vrot.lane.b32.xlu1 %v6711_v29, %s6035_s29 }
 0xc45   :  { %5813 = vrot.lane.b32.xlu0 %v6721_v31, %s6035_s29 }
 0xc53   :  { %v3339_v46 = vpop.xlane.xlu0 %3338 }
 0xc54   :  { %5917 = vrcp.f32 %v3339_v46 }
 0xc56   :  { %v3342_v8 = vpop.xlane.xlu1 %3341 }
 0xc57   :  { %5919 = vrcp.f32 %v3342_v8  ;;  %v3348_v2 = vpop.xlane.xlu0 %3347 }
 0xc58   :  { %5921 = vrcp.f32 %v3348_v2 }
 0xc5b   :  { %v3345_v48 = vpop.xlane.xlu0 %3344 }
 0xc5c   :  { %5923 = vrcp.f32 %v3345_v48 }
 0xc5e   :  { %v5918_v49 = vpop.eup %5917 }
 0xc5f   :  { %v3386_v36 = vmul.f32 %v5918_v49, %v6861_v22 }
 0xc61   :  { %v5920_v29 = vpop.eup %5919  ;;  %5295 = vmatprep.mubr.msk.f32.mxu1 %vm991_vm3, %v3386_v36 }
 0xc62   :  { %v3388_v31 = vmul.f32 %v5920_v29, %v6863_v27  ;;  %v5922_v4 = vpop.eup %5921 }
 0xc63   :  { %v3392_v47 = vmul.f32 %v5922_v4, %v6867_v17  ;;  %v4807_v4 = vld [vmem:[%s7120_s4 + $0x30] sm:$0xff] }
 0xc64   :  { %5296 = vmatmul.mubr.msk.f32.vlgmr.msra.gmra.mrb[38].mxu1 %vm991_vm3, %v3388_v31 }
 0xc65   :  { %5580 = vmatpush3.bf16.msra.mxu1 %v6780_v7 }
 0xc66   :  { %v5924_v19 = vpop.eup %5923  ;;  %5586 = vmatprep.subr.bf16.mxu1 %v5585_v33 }
 0xc67   :  { %v3390_v22 = vmul.f32 %v5924_v19, %v6873_v39  ;;  %v4808_v19 = vld [vmem:[%s7120_s4 + $0x38] sm:$0xff] }
 0xc68   :  { %v5609_v21 = vpack.c.bf16 %v4808_v19, %v4807_v4 }
 0xc69   :  { %5302 = vmatprep.mubr.msk.f32.mxu1 %vm991_vm3, %v3390_v22 }
 0xc6a   :  { %5303 = vmatmul.mubr.msk.f32.vlgmr.msra.gmra.mrb[40].mxu1 %vm991_vm3, %v3392_v47 }
 0xc6b   :  { %5588 = vmatpush3.bf16.msra.mxu1 %v5585_v33 }
 0xc6c   :  { %5594 = vmatprep.subr.bf16.mxu1 %v5593_v43 }
 0xca7   :  { %v3354_v27 = vpop.xlane.xlu1 %3353 }
 0xca8   :  { %5925 = vrcp.f32 %v3354_v27 }
 0xcab   :  { %v3351_v62 = vpop.xlane.xlu1 %3350 }
 0xcac   :  { %5927 = vrcp.f32 %v3351_v62  ;;  %v3360_v7 = vpop.xlane.xlu0 %3359 }
 0xcad   :  { %5929 = vrcp.f32 %v3360_v7 }
 0xcaf   :  { %v3366_v37 = vpop.xlane.xlu1 %3365 }
 0xcb0   :  { %v3357_v56 = vpop.xlane.xlu0 %3356 }
 0xcb1   :  { %5931 = vrcp.f32 %v3357_v56 }
 0xcb2   :  { %5933 = vrcp.f32 %v3366_v37  ;;  %v5926_v1 = vpop.eup %5925 }
 0xcb3   :  { %v3363_v39 = vpop.xlane.xlu1 %3362  ;;  %v3396_v5 = vmul.f32 %v5926_v1, %v6884_v18 }
 0xcb4   :  { %5935 = vrcp.f32 %v3363_v39  ;;  %v3372_v17 = vpop.xlane.xlu0 %3371 }
 0xcb5   :  { %5937 = vrcp.f32 %v3372_v17 }
 0xcb6   :  { %v5928_v52 = vpop.eup %5927 }
 0xcb7   :  { %v3378_v24 = vpop.xlane.xlu1 %3377  ;;  %v3394_v41 = vmul.f32 %v5928_v52, %v6890_v25  ;;  %v5930_v40 = vpop.eup %5929 }
 0xcb8   :  { %v3369_v9 = vpop.xlane.xlu0 %3368  ;;  %v3400_v18 = vmul.f32 %v5930_v40, %v6892_v32 }
 0xcb9   :  { %5939 = vrcp.f32 %v3369_v9  ;;  %5309 = vmatprep.mubr.msk.f32.mxu0 %vm991_vm3, %v3394_v41 }
 0xcba   :  { %5310 = vmatmul.mubr.msk.f32.vlgmr.msra.gmra.mrb[30].mxu0 %vm991_vm3, %v3396_v5  ;;  %5941 = vrcp.f32 %v3378_v24 }
 0xcbb   :  { %v5932_v16 = vpop.eup %5931  ;;  %5592 = vmatpush3.bf16.msra.mxu0 %v6919_v14  ;;  %v3375_v50 = vpop.xlane.xlu1 %3374 }
 0xcbc   :  { %5943 = vrcp.f32 %v3375_v50  ;;  %v3381_v55 = vpop.xlane.xlu0 %3380  ;;  %v3398_v23 = vmul.f32 %v5932_v16, %v6902_v10  ;;  %v5934_v25 = vpop.eup %5933 }
 0xcbd   :  { %5945 = vrcp.f32 %v3381_v55  ;;  %v3404_v35 = vmul.f32 %v5934_v25, %v6900_v28 }
 0xcbe   :  { %v5936_v20 = vpop.eup %5935  ;;  %5316 = vmatprep.mubr.msk.f32.mxu1 %vm991_vm3, %v3398_v23 }
 0xcbf   :  { %5317 = vmatmul.mubr.msk.f32.vlgmr.msra.gmra.mrb[42].mxu1 %vm991_vm3, %v3400_v18  ;;  %v3384_v6 = vpop.xlane.xlu1 %3383  ;;  %v3402_v54 = vmul.f32 %v5936_v20, %v6909_v59  ;;  %v5938_v10 = vpop.eup %5937 }
 0xcc0   :  { %5596 = vmatpush3.bf16.msra.mxu1 %v5593_v43  ;;  %5947 = vrcp.f32 %v3384_v6  ;;  %v5814_v53 = vpop.permute.xlu0 %5813  ;;  %v3408_v28 = vmul.f32 %v5938_v10, %v6911_v12 }
 0xcc1   :  { %v5816_v14 = vunpack.i.h.bf16 %v5814_v53  ;;  %v5815_v15 = vunpack.i.l.bf16 %v5814_v53  ;;  %5323 = vmatprep.mubr.msk.f32.mxu0 %vm991_vm3, %v3402_v54 }
 0xcc2   :  { %5324 = vmatmul.mubr.msk.f32.vlgmr.msra.gmra.mrb[32].mxu0 %vm991_vm3, %v3404_v35 }
 0xcc3   :  { %v5940_v32 = vpop.eup %5939  ;;  %v5601_v0 = vpack.c.bf16 %v5816_v14, %v5815_v15  ;;  %v5809_v11 = vpop.permute.xlu1 %5808 }
 0xcc4   :  { %v5811_v42 = vunpack.i.h.bf16 %v5809_v11  ;;  %v5810_v45 = vunpack.i.l.bf16 %v5809_v11  ;;  %v3406_v63 = vmul.f32 %v5940_v32, %v6921_v60  ;;  %v5942_v59 = vpop.eup %5941  ;;  %v4818_v11 = vld [vmem:[%s7124_s8 + $0x20] sm:$0xff] }
 0xcc5   :  { %5602 = vmatprep.subr.bf16.mxu1 %v5601_v0  ;;  %v3412_v12 = vmul.f32 %v5942_v59, %v6917_v13  ;;  %v4806_v13 = vld [vmem:[%s7120_s4 + $0x28] sm:$0xff]  ;;  %v4821_v59 = vld [vmem:[%s7124_s8 + $0x38] sm:$0xff] }
 0xcc6   :  { %v5944_v46 = vpop.eup %5943  ;;  %v5597_v8 = vpack.c.bf16 %v5811_v42, %v5810_v45  ;;  %5330 = vmatprep.mubr.msk.f32.mxu1 %vm991_vm3, %v3406_v63  ;;  %v4819_v42 = vld [vmem:[%s7124_s8 + $0x28] sm:$0xff]  ;;  %v4820_v63 = vld [vmem:[%s7124_s8 + $0x30] sm:$0xff] }
 0xcc7   :  { %v5946_v2 = vpop.eup %5945  ;;  %5331 = vmatmul.mubr.msk.f32.vlgmr.msra.gmra.mrb[44].mxu1 %vm991_vm3, %v3408_v28  ;;  %v3410_v48 = vmul.f32 %v5944_v46, %v6928_v3  ;;  %v5613_v45 = vpack.c.bf16 %v4819_v42, %v4818_v11  ;;  %v5617_v28 = vpack.c.bf16 %v4821_v59, %v4820_v63  ;;  %v4827_v46 = vld [vmem:[%s7126_s10 + $0x40] sm:$0xff] }
 0xcc8   :  { %5604 = vmatpush3.bf16.msra.mxu1 %v5601_v0  ;;  %5598 = vmatprep.subr.bf16.mxu0 %v5597_v8  ;;  %v3414_v49 = vmul.f32 %v5946_v2, %v6930_v38  ;;  %v4805_v38 = vld [vmem:[%s7120_s4 + $0x20] sm:$0xff]  ;;  %v4829_v2 = vld [vmem:[%s7126_s10 + $0x50] sm:$0xff] }
 0xcc9   :  { %5600 = vmatpush3.bf16.msra.mxu0 %v5597_v8  ;;  %5337 = vmatprep.mubr.msk.f32.mxu0 %vm991_vm3, %v3410_v48  ;;  %v4828_v8 = vld [vmem:[%s7126_s10 + $0x48] sm:$0xff]  ;;  %v4816_v59 = vld [vmem:[%s7122_s6 + $0x1] ss:$0 sm:$0xff] }
 0xcca   :  { %v5948_v60 = vpop.eup %5947  ;;  %5344 = vmatprep.mubr.msk.f32.mxu1 %vm991_vm3, %v3414_v49  ;;  %5614 = vmatprep.subr.bf16.mxu1 %v5613_v45  ;;  %v5621_v48 = vpack.c.bf16 %v4828_v8, %v4827_v46  ;;  %v4830_v49 = vld [vmem:[%s7126_s10 + $0x58] sm:$0xff] }
 0xccb   :  { %v3416_v36 = vmul.f32 %v5948_v60, %v6936_v44  ;;  %v5605_v44 = vpack.c.bf16 %v4806_v13, %v4805_v38  ;;  %v5625_v60 = vpack.c.bf16 %v4830_v49, %v4829_v2 }
 0xccc   :  { %5338 = vmatmul.mubr.msk.f32.vlgmr.msra.gmra.mrb[34].mxu0 %vm991_vm3, %v3412_v12  ;;  %v4831_v12 = vld [vmem:[%s7126_s10 + $0x60] sm:$0xff] }
 0xccd   :  { %5345 = vmatmul.mubr.msk.f32.vlgmr.msra.gmra.mrb[46].mxu1 %vm991_vm3, %v3416_v36  ;;  %5606 = vmatprep.subr.bf16.mxu0 %v5605_v44  ;;  %v4832_v36 = vld [vmem:[%s7126_s10 + $0x68] sm:$0xff] }
 0xcce   :  { %5608 = vmatpush3.bf16.msra.mxu0 %v5605_v44  ;;  %5616 = vmatpush3.bf16.msra.mxu1 %v5613_v45 }
 0xccf   :  { %5610 = vmatprep.subr.bf16.mxu0 %v5609_v21  ;;  %5618 = vmatprep.subr.bf16.mxu1 %v5617_v28 }
 0xcd2   :  { %5612 = vmatpush3.bf16.msra.mxu0 %v5609_v21  ;;  %5620 = vmatpush3.bf16.msra.mxu1 %v5617_v28 }
 0xcd3   :  { %5622 = vmatprep.subr.bf16.mxu0 %v5621_v48 }
 0xd37   :  { %v5297_v51 = vpop.f32.mrb[38].mxu1 }
 0xd38   :  { %v3495_v3 = vpop.f32.mrb[39].mxu1 }
 0xd3d   :  { %v5304_v34 = vpop.f32.mrb[40].mxu1 }
 0xd3e   :  { %v3582_v29 = vpop.f32.mrb[41].mxu1 }
 0xd8d   :  { %v5311_v31 = vpop.f32.mrb[30].mxu0 }
 0xd8e   :  { %v3669_v33 = vpop.f32.mrb[31].mxu0  ;;  %4119 = vrot.lane.b32.xlu0 %v5311_v31, %s6036_s15 }
 0xd8f   :  { %4117 = vrot.lane.b32.xlu1 %v3669_v33, %s6036_s15 }
 0xd92   :  { %v5318_v30 = vpop.f32.mrb[42].mxu1 }
 0xd93   :  { %4123 = vrot.lane.b32.xlu0 %v5318_v30, %s6036_s15  ;;  %v3756_v22 = vpop.f32.mrb[43].mxu1 }
 0xd94   :  { %4121 = vrot.lane.b32.xlu1 %v3756_v22, %s6036_s15 }
 0xd95   :  { %v5325_v47 = vpop.f32.mrb[32].mxu0 }
 0xd96   :  { %v3843_v43 = vpop.f32.mrb[33].mxu0 }
 0xd97   :  { %4135 = vrot.lane.b32.xlu0 %v5325_v47, %s6026_s23 }
 0xd98   :  { %4133 = vrot.lane.b32.xlu1 %v3843_v43, %s6026_s23 }
 0xd9a   :  { %v5332_v27 = vpop.f32.mrb[44].mxu1 }
 0xd9b   :  { %4139 = vrot.lane.b32.xlu0 %v5332_v27, %s6026_s23  ;;  %v3930_v62 = vpop.f32.mrb[45].mxu1 }
 0xd9c   :  { %4137 = vrot.lane.b32.xlu1 %v3930_v62, %s6026_s23 }
 0xd9f   :  { %v5339_v7 = vpop.f32.mrb[34].mxu0 }
 0xda0   :  { %v4017_v37 = vpop.f32.mrb[35].mxu0  ;;  %4151 = vrot.lane.b32.xlu0 %v5339_v7, %s6037_s21  ;;  %v5346_v56 = vpop.f32.mrb[46].mxu1 }
 0xda1   :  { %4149 = vrot.lane.b32.xlu1 %v4017_v37, %s6037_s21  ;;  %v4104_v39 = vpop.f32.mrb[47].mxu1 }
 0xda4   :  { %4155 = vrot.lane.b32.xlu0 %v5346_v56, %s6037_s21 }
 0xda5   :  { %4153 = vrot.lane.b32.xlu1 %v4104_v39, %s6037_s21 }
 0xe00   :  { %v4120_v17 = vpop.permute.xlu0 %4119 }
 0xe01   :  { %v4118_v1 = vpop.permute.xlu1 %4117  ;;  %v4162_v55 = vsel %vm282_vm1, %v5297_v51, %v4120_v17  ;;  %v5629_v51 = vpack.c.bf16 %v4832_v36, %v4831_v12 }
 0xe02   :  { %v4161_v16 = vsel %vm282_vm1, %v3495_v3, %v4118_v1  ;;  %v4810_v3 = vld [vmem:[%s7121_s5 + $0x1] ss:$0 sm:$0xff] }
 0xe05   :  { %v4124_v52 = vpop.permute.xlu0 %4123 }
 0xe06   :  { %v4122_v24 = vpop.permute.xlu1 %4121  ;;  %v4164_v53 = vsel %vm282_vm1, %v5304_v34, %v4124_v52 }
 0xe07   :  { %v4163_v54 = vsel %vm282_vm1, %v3582_v29, %v4122_v24 }
 0xe09   :  { %v4136_v41 = vpop.permute.xlu0 %4135 }
 0xe0a   :  { %v4134_v5 = vpop.permute.xlu1 %4133  ;;  %v4166_v18 = vsel %vm991_vm3, %v4162_v55, %v4136_v41 }
 0xe0b   :  { %v4165_v23 = vsel %vm991_vm3, %v4161_v16, %v4134_v5 }
 0xe0d   :  { %v4140_v9 = vpop.permute.xlu0 %4139 }
 0xe0e   :  { %v4138_v40 = vpop.permute.xlu1 %4137  ;;  %v4168_v10 = vsel %vm991_vm3, %v4164_v53, %v4140_v9 }
 0xe0f   :  { %v4167_v14 = vsel %vm991_vm3, %v4163_v54, %v4138_v40 }
 0xe12   :  { %v4152_v50 = vpop.permute.xlu0 %4151 }
 0xe13   :  { %v4150_v25 = vpop.permute.xlu1 %4149  ;;  %v4170_v6 = vsel %vm1920_vm4, %v4166_v18, %v4152_v50 }
 0xe14   :  { %v4169_v20 = vsel %vm1920_vm4, %v4165_v23, %v4150_v25 }
 0xe15   :  { %5355 = vmatprep.mubr.msk.f32.mxu0 %vm152_vm0, %v4169_v20 }
 0xe16   :  { %5356 = vmatmul.mubr.msk.f32.vlgmr.msra.gmra.mrb[36].mxu0 %vm152_vm0, %v4170_v6  ;;  %v4156_v35 = vpop.permute.xlu0 %4155 }
 0xe17   :  { %v4154_v15 = vpop.permute.xlu1 %4153  ;;  %v4172_v0 = vsel %vm1920_vm4, %v4168_v10, %v4156_v35  ;;  %5624 = vmatpush3.bf16.msra.mxu0 %v5621_v48  ;;  %v4817_v48 = vld [vmem:[#allocation2 + $0x1] ss:$0 sm:$0xff] }
 0xe18   :  { %v4171_v32 = vsel %vm1920_vm4, %v4167_v14, %v4154_v15  ;;  %5626 = vmatprep.subr.bf16.mxu0 %v5625_v60 }
 0xe19   :  { %5358 = vmatprep.mubr.msk.f32.mxu0 %vm152_vm0, %v4171_v32 }
 0xe1a   :  { %5359 = vmatmul.mubr.msk.f32.gmra.mrb[38].mxu0 %vm152_vm0, %v4172_v0 }
 0xe1b   :  { %5628 = vmatpush3.bf16.msra.mxu0 %v5625_v60 }
 0xe1c   :  { %5630 = vmatprep.subr.bf16.mxu0 %v5629_v51 }
 0xe1f   :  { %5632 = vmatpush3.bf16.msra.mxu0 %v5629_v51 }
 0xee9   :  { %v5357_v34 = vpop.f32.mrb[36].mxu0 }
 0xeea   :  { %v4270_v29 = vadd.f32 %v5357_v34, %v4810_v3  ;;  %v4264_v31 = vpop.f32.mrb[37].mxu0 }
 0xeeb   :  { %v4265_v38 = vadd.f32 %v4810_v3, %v4264_v31  ;;  %v4833_v31 = vld [vmem:[%s7126_s10 + $0x70] sm:$0xff] }
 0xeec   :  { %v4284_v13 = vadd.f32 %v4270_v29, %v6647_v57 }
 0xeed   :  { %v4283_v33 = vadd.f32 %v4265_v38, %v6645_v26  ;;  %v5360_v44 = vpop.f32.mrb[38].mxu0  ;;  %v4834_v38 = vld [vmem:[%s7126_s10 + $0x78] sm:$0xff] }
 0xeee   :  { %v4292_v4 = vsel %vm152_vm0, %v4284_v13, 0.0  ;;  %v4306_v19 = vmul.f32 %v4284_v13, %v4284_v13  ;;  %v4280_v21 = vadd.f32 %v5360_v44, %v4810_v3  ;;  %v4274_v30 = vpop.f32.mrb[39].mxu0 }
 0xeef   :  { %v4291_v22 = vsel %vm152_vm0, %v4283_v33, 0.0  ;;  %v4305_v47 = vmul.f32 %v4283_v33, %v4283_v33  ;;  %v4275_v43 = vadd.f32 %v4810_v3, %v4274_v30 }
 0xef0   :  { %v4310_v27 = vsel %vm152_vm0, %v4306_v19, 0.0  ;;  %v4293_v62 = vadd.f32 %v4292_v4, %v4291_v22  ;;  %v4286_v7 = vadd.f32 %v4280_v21, %v6657_v61 }
 0xef1   :  { %v4309_v37 = vsel %vm152_vm0, %v4305_v47, 0.0  ;;  %v4285_v57 = vadd.f32 %v4275_v43, %v6651_v58 }
 0xef2   :  { %v4311_v26 = vadd.f32 %v4310_v27, %v4309_v37  ;;  %v4308_v56 = vmul.f32 %v4286_v7, %v4286_v7  ;;  %v4296_v52 = vsel %vm152_vm0, %v4286_v7, 0.0 }
 0xef3   :  { %v4294_v39 = vsel %vm152_vm0, %v4285_v57, 0.0  ;;  %v4307_v17 = vmul.f32 %v4285_v57, %v4285_v57 }
 0xef4   :  { %v4295_v1 = vadd.f32 %v4294_v39, %v4293_v62  ;;  %v4314_v9 = vsel %vm152_vm0, %v4308_v56, 0.0 }
 0xef5   :  { %v4312_v24 = vsel %vm152_vm0, %v4307_v17, 0.0 }
 0xef6   :  { %v4297_v41 = vadd.f32 %v4296_v52, %v4295_v1  ;;  %v4313_v5 = vadd.f32 %v4312_v24, %v4311_v26 }
 0xef8   :  { %v4298_v40 = vrot.slane %v4297_v41, 4  ;;  %v4315_v61 = vadd.f32 %v4314_v9, %v4313_v5 }
 0xefa   :  { %v4299_v16 = vadd.f32 %v4298_v40, %v4297_v41  ;;  %v4316_v50 = vrot.slane %v4315_v61, 4 }
 0xefc   :  { %v4300_v55 = vrot.slane %v4299_v16, 2  ;;  %v4317_v58 = vadd.f32 %v4316_v50, %v4315_v61 }
 0xefe   :  { %v4301_v23 = vadd.f32 %v4300_v55, %v4299_v16  ;;  %v4318_v25 = vrot.slane %v4317_v58, 2 }
 0xf00   :  { %v4302_v18 = vrot.slane %v4301_v23, 1  ;;  %v4319_v20 = vadd.f32 %v4318_v25, %v4317_v58 }
 0xf02   :  { %v4303_v6 = vadd.f32 %v4302_v18, %v4301_v23  ;;  %v4320_v54 = vrot.slane %v4319_v20, 1 }
 0xf04   :  { %v4304_v35 = vmul.f32 0.03125, %v4303_v6  ;;  %v4321_v53 = vadd.f32 %v4320_v54, %v4319_v20 }
 0xf06   :  { %v4322_v14 = vmul.f32 0.03125, %v4321_v53  ;;  %v4323_v15 = vmul.f32 %v4304_v35, %v4304_v35  ;;  %v4327_v10 = vsub.f32 %v4285_v57, %v4304_v35  ;;  %v4325_v32 = vsub.f32 %v4283_v33, %v4304_v35  ;;  %v4822_v33 = vld [vmem:[#allocation5 + $0x1] ss:$0 sm:$0xff]  ;;  %v4836_v57 = vld [vmem:[%s7127_s11 + $0x1] ss:$0 sm:$0xff] }
 0xf07   :  { %v4326_v0 = vsub.f32 %v4284_v13, %v4304_v35  ;;  %v4328_v11 = vsub.f32 %v4286_v7, %v4304_v35  ;;  %v5633_v13 = vpack.c.bf16 %v4834_v38, %v4833_v31 }
 0xf08   :  { %v4324_v42 = vsub.f32 %v4322_v14, %v4323_v15 }
 0xf09   :  { %5634 = vmatprep.subr.bf16.mxu0 %v5633_v13 }
 0xf0a   :  { %v4329_v45 = vadd.f32 1e-05, %v4324_v42  ;;  %5636 = vmatpush3.bf16.msra.mxu0 %v5633_v13 }
 0xf0c   :  { %5949 = vrsqrt.f32 %v4329_v45 }
 0xf16   :  { %v5950_v63 = vpop.eup %5949 }
 0xf17   :  { %v4333_v28 = vmul.f32 %v5950_v63, %v4327_v10  ;;  %v4331_v46 = vmul.f32 %v5950_v63, %v4325_v32  ;;  %v4332_v8 = vmul.f32 %v5950_v63, %v4326_v0  ;;  %v4334_v2 = vmul.f32 %v5950_v63, %v4328_v11 }
 0xf19   :  { %v4341_v49 = vmul.f32 %v4816_v59, %v4331_v46  ;;  %v4342_v60 = vmul.f32 %v4816_v59, %v4332_v8  ;;  %v4343_v12 = vmul.f32 %v4816_v59, %v4333_v28  ;;  %v4344_v3 = vmul.f32 %v4816_v59, %v4334_v2 }
 0xf1b   :  { %v4351_v36 = vadd.f32 %v4817_v48, %v4341_v49  ;;  %v4352_v51 = vadd.f32 %v4817_v48, %v4342_v60  ;;  %v4353_v34 = vadd.f32 %v4817_v48, %v4343_v12  ;;  %v4354_v29 = vadd.f32 %v4817_v48, %v4344_v3 }
 0xf1d   :  { %5369 = vmatprep.mubr.msk.f32.mxu1 %vm152_vm0, %v4351_v36 }
 0xf1e   :  { %5370 = vmatmul.mubr.msk.f32.vlgmr.msra.gmra.mrb[48].mxu1 %vm152_vm0, %v4352_v51 }
 0xf1f   :  { %5372 = vmatprep.mubr.msk.f32.mxu1 %vm152_vm0, %v4353_v34 }
 0xf22   :  { %5373 = vmatmul.mubr.msk.f32.gmra.mrb[50].mxu1 %vm152_vm0, %v4354_v29 }
 0xff1   :  { %v5371_v44 = vpop.f32.mrb[48].mxu1 }
 0xff2   :  { %v4452_v4 = vadd.f32 %v5371_v44, %v4822_v33  ;;  %v4446_v19 = vpop.f32.mrb[49].mxu1 }
 0xff3   :  { %v4447_v21 = vadd.f32 %v4822_v33, %v4446_v19 }
 0xff4   :  { %v4466_v47 = vmax.f32 %v4452_v4, 0.0  ;;  %v4843_v4 = vld [vmem:[%s7128_s12 + $0x1] ss:$0 sm:$0xff]  ;;  %s5997_s12 = scalar_lea.vmem %s4665_s18, 512 }
 0xff5   :  { %v4465_v30 = vmax.f32 %v4447_v21, 0.0  ;;  %v5374_v22 = vpop.f32.mrb[50].mxu1  ;;  %p5998_p2 = scmp.ne.s32.totalorder %s4665_s18, %s5997_s12  ;;  %p6003_p4 = scmp.lt.s32.totalorder %s5997_s12, %s5997_s12 }
 0xff6   :  { %v4462_v43 = vadd.f32 %v5374_v22, %v4822_v33  ;;  %v4456_v27 = vpop.f32.mrb[51].mxu1 }
 0xff7   :  { %v4457_v62 = vadd.f32 %v4822_v33, %v4456_v27  ;;  %5391 = vmatprep.mubr.msk.f32.mxu0 %vm2231_vm5, %v4465_v30  ;;  %p6004_p5 = por %p6003_p4, %p6002_p3 }
 0xff8   :  { %5392 = vmatmul.mubr.msk.f32.vlgmr.msra.gmra.mrb[40].mxu0 %vm2231_vm5, %v4466_v47  ;;  %v4468_v37 = vmax.f32 %v4462_v43, 0.0  ;;  %v4844_v47 = vld [vmem:[%s7129_s13 + $0x1] ss:$0 sm:$0xff] }
 0xff9   :  { %v4467_v7 = vmax.f32 %v4457_v62, 0.0  ;;  %p6005_p6 = pnand %p6004_p5, %p5998_p2 }
 0xffb   :  { %5394 = vmatprep.mubr.msk.f32.mxu0 %vm2231_vm5, %v4467_v7 }
 0xffc   :  { %5395 = vmatmul.mubr.msk.f32.gmra.mrb[42].mxu0 %vm2231_vm5, %v4468_v37 }
0x10cb   :  { %v5393_v26 = vpop.f32.mrb[40].mxu0 }
0x10cc   :  { %v4570_v56 = vadd.f32 %v5393_v26, %v4836_v57  ;;  %v4564_v39 = vpop.f32.mrb[41].mxu0 }
0x10cd   :  { %v4565_v17 = vadd.f32 %v4836_v57, %v4564_v39 }
0x10ce   :  { %v4584_v1 = vadd.f32 %v4570_v56, %v4352_v51 }
0x10cf   :  { %v4583_v52 = vadd.f32 %v4565_v17, %v4351_v36  ;;  %v5396_v24 = vpop.f32.mrb[42].mxu0 }
0x10d0   :  { %v4592_v41 = vsel %vm152_vm0, %v4584_v1, 0.0  ;;  %v4606_v5 = vmul.f32 %v4584_v1, %v4584_v1  ;;  %v4580_v9 = vadd.f32 %v5396_v24, %v4836_v57  ;;  %v4574_v40 = vpop.f32.mrb[43].mxu0 }
0x10d1   :  { %v4591_v61 = vsel %vm152_vm0, %v4583_v52, 0.0  ;;  %v4605_v16 = vmul.f32 %v4583_v52, %v4583_v52  ;;  %v4575_v50 = vadd.f32 %v4836_v57, %v4574_v40 }
0x10d2   :  { %v4610_v55 = vsel %vm152_vm0, %v4606_v5, 0.0  ;;  %v4593_v58 = vadd.f32 %v4592_v41, %v4591_v61  ;;  %v4586_v23 = vadd.f32 %v4580_v9, %v4354_v29 }
0x10d3   :  { %v4609_v25 = vsel %vm152_vm0, %v4605_v16, 0.0  ;;  %v4585_v18 = vadd.f32 %v4575_v50, %v4353_v34 }
0x10d4   :  { %v4611_v20 = vadd.f32 %v4610_v55, %v4609_v25  ;;  %v4608_v6 = vmul.f32 %v4586_v23, %v4586_v23  ;;  %v4596_v14 = vsel %vm152_vm0, %v4586_v23, 0.0 }
0x10d5   :  { %v4594_v54 = vsel %vm152_vm0, %v4585_v18, 0.0  ;;  %v4607_v35 = vmul.f32 %v4585_v18, %v4585_v18 }
0x10d6   :  { %v4595_v53 = vadd.f32 %v4594_v54, %v4593_v58  ;;  %v4614_v0 = vsel %vm152_vm0, %v4608_v6, 0.0 }
0x10d7   :  { %v4612_v15 = vsel %vm152_vm0, %v4607_v35, 0.0 }
0x10d8   :  { %v4597_v10 = vadd.f32 %v4596_v14, %v4595_v53  ;;  %v4613_v32 = vadd.f32 %v4612_v15, %v4611_v20 }
0x10da   :  { %v4598_v11 = vrot.slane %v4597_v10, 4  ;;  %v4615_v42 = vadd.f32 %v4614_v0, %v4613_v32 }
0x10dc   :  { %v4599_v45 = vadd.f32 %v4598_v11, %v4597_v10  ;;  %v4616_v63 = vrot.slane %v4615_v42, 4 }
0x10de   :  { %v4600_v59 = vrot.slane %v4599_v45, 2  ;;  %v4617_v28 = vadd.f32 %v4616_v63, %v4615_v42 }
0x10e0   :  { %v4601_v46 = vadd.f32 %v4600_v59, %v4599_v45  ;;  %v4618_v8 = vrot.slane %v4617_v28, 2 }
0x10e2   :  { %v4602_v2 = vrot.slane %v4601_v46, 1  ;;  %v4619_v48 = vadd.f32 %v4618_v8, %v4617_v28 }
0x10e4   :  { %v4603_v49 = vadd.f32 %v4602_v2, %v4601_v46  ;;  %v4620_v60 = vrot.slane %v4619_v48, 1 }
0x10e6   :  { %v4604_v12 = vmul.f32 0.03125, %v4603_v49  ;;  %v4621_v36 = vadd.f32 %v4620_v60, %v4619_v48 }
0x10e8   :  { %v4622_v51 = vmul.f32 0.03125, %v4621_v36  ;;  %v4623_v3 = vmul.f32 %v4604_v12, %v4604_v12  ;;  %v4625_v34 = vsub.f32 %v4583_v52, %v4604_v12  ;;  %v4626_v29 = vsub.f32 %v4584_v1, %v4604_v12 }
0x10e9   :  { %v4627_v31 = vsub.f32 %v4585_v18, %v4604_v12  ;;  %v4628_v38 = vsub.f32 %v4586_v23, %v4604_v12 }
0x10ea   :  { %v4624_v13 = vsub.f32 %v4622_v51, %v4623_v3 }
0x10ec   :  { %v4629_v33 = vadd.f32 1e-05, %v4624_v13 }
0x10ee   :  { %5951 = vrsqrt.f32 %v4629_v33 }
0x10f8   :  { %v5952_v44 = vpop.eup %5951 }
0x10f9   :  { %v4631_v19 = vmul.f32 %v5952_v44, %v4625_v34  ;;  %v4632_v21 = vmul.f32 %v5952_v44, %v4626_v29  ;;  %v4633_v30 = vmul.f32 %v5952_v44, %v4627_v31  ;;  %v4634_v22 = vmul.f32 %v5952_v44, %v4628_v38 }
0x10fb   :  { %v4641_v43 = vmul.f32 %v4843_v4, %v4631_v19  ;;  %v4642_v27 = vmul.f32 %v4843_v4, %v4632_v21  ;;  %v4643_v62 = vmul.f32 %v4843_v4, %v4633_v30  ;;  %v4644_v7 = vmul.f32 %v4843_v4, %v4634_v22 }
0x10fd   :  { %v4653_v37 = vadd.f32 %v4844_v47, %v4643_v62  ;;  %v4651_v57 = vadd.f32 %v4844_v47, %v4641_v43  ;;  %v4652_v26 = vadd.f32 %v4844_v47, %v4642_v27  ;;  %v4654_v56 = vadd.f32 %v4844_v47, %v4644_v7 }
0x10ff   :  { %4657 = vst.msk [vmem:[#allocation7 + $0x10] sm:$0xff] %vm152_vm0, %v4653_v37  ;;  %4655 = vst.msk [vmem:[#allocation7] sm:$0xff] %vm152_vm0, %v4651_v57 }
0x1100   :  { %4656 = vst.msk [vmem:[#allocation7 + $0x8] sm:$0xff] %vm152_vm0, %v4652_v26  ;;  %4658 = vst.msk [vmem:[#allocation7 + $0x18] sm:$0xff] %vm152_vm0, %v4654_v56 }
0x1101   :  { %6008 = shalt.err (!%p6005_p6)
}
0x1102   :  { %s6009_s3 = scalar_lea.hbm %s7130_s14, 512 }
0x1103   :  { %p6010_p7 = scmp.ne.s32.totalorder %s7130_s14, %s6009_s3  ;;  %p6013_p8 = scmp.lt.u32.totalorder %s6009_s3, %s7130_s14 }
0x1105   :  { %p6015_p9 = pnand %p6013_p8, %p6010_p7 }
0x1107   :  { %6018 = shalt.err (!%p6015_p9)
}
0x1108   :  { %s6039_s8 = smov 128  }
0x1109   :  { %4670 = dma.vmem_to_hbm [thread:$0]  %s4665_s18, 512, %s7130_s14, [#allocation4], %s6039_s8, %s6039_s8, %s6036_s15  }
0x110a   :  { %6023 = dma.done.wait [#allocation4], 512  }
0x110b   :  { %6024 = vsyncadd [#allocation4], 4294966784 }
0x110c   :  { %4674 = vsyncpa [#allocation3], 1 }
0x110d   :  { %4675 = vsyncpa [#allocation6], 1 }
0x110e   :  { %4676 = vsyncpa [#allocation4], 1 }

</bundles_post_ra>
